<compile_context>
chip_gen: v5e
topology: v5e:2x2
jax: 0.10.0
libtpu: 0.0.40
codegen_flags: <defaults>
</compile_context>

<pallas_src>
import numpy as np
import jax
import jax.numpy as jnp
from jax.experimental import pallas as pl
from jax.experimental.pallas import tpu as pltpu


# ----------------------------------------------------------------------------
# Fused kernel: GCN -> LSTM input projection -> LSTM recurrence -> epilogue.
# One grid step == one batch element.
# ----------------------------------------------------------------------------
def fused_am_lstm_gcn_kernel(x_ref, adj_ref, w1_ref, b1_ref, w2_ref, b2_ref,
                             wih_ref, blstm_ref, whh_ref,
                             xs_ref, wr_ref, br_ref, fcw_ref, fcb_ref,
                             gamma_ref, beta_ref, wf_ref, bf_ref,
                             o_ref, xp_ref):
    T, N, H4 = xp_ref.shape
    H = whh_ref.shape[0]
    G1 = w1_ref.shape[1]
    G2 = w2_ref.shape[1]
    P = fcw_ref.shape[0]

    # ---- 2-layer GCN; adjacency applied as one batched matmul per layer. ---
    # TODO(synk): GCN_layer source is unavailable; a standard 2-layer graph
    #             convolution relu(A@X@W1+b1) -> A@H@W2+b2 is assumed.
    adj_b = jnp.broadcast_to(adj_ref[...], (T, N, N))   # hoisted, reused twice
    x2 = x_ref[0]                                        # (T*N, Fin), rows (t,n)
    xw1 = jnp.dot(x2, w1_ref[...],
                  preferred_element_type=jnp.float32).reshape(T, N, G1)
    h1 = jnp.maximum(
        jnp.einsum('tij,tjg->tig', adj_b, xw1,
                   preferred_element_type=jnp.float32) + b1_ref[...], 0.0)
    h1w2 = jnp.dot(h1.reshape(T * N, G1), w2_ref[...],
                   preferred_element_type=jnp.float32).reshape(T, N, G2)
    gcn = jnp.einsum('tij,tjg->tig', adj_b, h1w2,
                     preferred_element_type=jnp.float32) + b2_ref[...]

    # ---- LSTM input projection hoisted out of the recurrence (one matmul). -
    xp = jnp.dot(gcn.reshape(T * N, G2), wih_ref[...],
                 preferred_element_type=jnp.float32) + blstm_ref[...]
    xp_ref[...] = xp.reshape(T, N, H4)

    # ---- LSTM recurrence; gate columns pre-permuted to [i, f, o | g]. ------
    whh = whh_ref[...]

    def step(t, carry):
        h, c = carry
        gates = xp_ref[t] + jnp.dot(h, whh, preferred_element_type=jnp.float32)
        sig = jax.nn.sigmoid(gates[:, :3 * H])           # one EUP push, 3H lanes
        g = jnp.tanh(gates[:, 3 * H:])
        c = sig[:, H:2 * H] * c + sig[:, :H] * g
        h = sig[:, 2 * H:] * jnp.tanh(c)
        return h, c

    h, _ = jax.lax.fori_loop(
        0, T, step,
        (jnp.zeros((N, H), jnp.float32), jnp.zeros((N, H), jnp.float32)),
        unroll=True)

    # ---- Epilogue: fc + residual conv + ReLU + LayerNorm + final conv. -----
    C = G2
    res = (jnp.dot(xs_ref[0], wr_ref[...],
                   preferred_element_type=jnp.float32)
           + br_ref[...]).reshape(P, N, C)               # rows (p, n)
    tout = h[None, :, :] * fcw_ref[...][:, None, :] + fcb_ref[...][:, None, :]
    v = jnp.maximum(res + tout, 0.0)                     # (P, N, C)
    mean = jnp.mean(v, axis=-1, keepdims=True)
    var = jnp.mean(jnp.square(v - mean), axis=-1, keepdims=True)
    x_ln = (v - mean) * jax.lax.rsqrt(var + 1e-5) * gamma_ref[...] + beta_ref[...]
    pred = bf_ref[...]                                   # (1, P), broadcasts up
    for p in range(P):      # pre_len tiny & static: final conv as summed matmuls
        pred = pred + jnp.dot(x_ln[p], wf_ref[p],
                              preferred_element_type=jnp.float32)
    o_ref[...] = pred.reshape(1, N, P)


# ----------------------------------------------------------------------------
# Host wrapper: layout prep (free XLA glue) + the single pallas_call.
# ----------------------------------------------------------------------------
def am_lstm_gcn_forward(x, adj, params, *, pre_len):
    B, N, T, Fin = x.shape
    G1 = params["w1"].shape[1]
    G2 = params["w2"].shape[1]
    H = params["whh"].shape[0]
    H4 = 4 * H
    P = pre_len
    assert G2 == H, "gcn2_out_feature must equal nb_time_filter (residual add)"

    # x rows ordered (t, n): all in-kernel reshapes stay lane-preserving.
    x_tn = jnp.transpose(x, (0, 2, 1, 3)).reshape(B, T * N, Fin)
    # Residual strided time samples (1x1 conv, stride T//pre_len), rows (p, n).
    s = T // pre_len
    xs = jnp.transpose(x[:, :, ::s, :], (0, 2, 1, 3)).reshape(B, P * N, Fin)

    # LSTM gate permutation [i, f, g, o] -> [i, f, o | g].
    perm = np.concatenate([np.arange(0, 2 * H),
                           np.arange(3 * H, 4 * H),
                           np.arange(2 * H, 3 * H)])
    wih = params["wih"][:, perm]
    whh = params["whh"][:, perm]
    blstm = params["blstm"][perm].reshape(1, H4)

    # fc(1 -> pre_len) weights broadcast over channels; final-conv weight as
    # (p_in, C, p_out) so the kernel indexes it with a static leading p.
    fcw_bc = jnp.broadcast_to(params["fcw"].reshape(P, 1), (P, G2))
    fcb_bc = jnp.broadcast_to(params["fcb"].reshape(P, 1), (P, G2))
    wf2 = jnp.transpose(params["wf"], (1, 2, 0))

    pred = pl.pallas_call(
        fused_am_lstm_gcn_kernel,
        out_shape=jax.ShapeDtypeStruct((B, N, P), jnp.float32),
        grid=(B,),
        in_specs=[
            pl.BlockSpec((1, T * N, Fin), lambda b: (b, 0, 0)),   # x (t,n) rows
            pl.BlockSpec((N, N), lambda b: (0, 0)),               # adj
            pl.BlockSpec((Fin, G1), lambda b: (0, 0)),            # w1
            pl.BlockSpec((1, G1), lambda b: (0, 0)),              # b1
            pl.BlockSpec((G1, G2), lambda b: (0, 0)),             # w2
            pl.BlockSpec((1, G2), lambda b: (0, 0)),              # b2
            pl.BlockSpec((G2, H4), lambda b: (0, 0)),             # wih (permuted)
            pl.BlockSpec((1, H4), lambda b: (0, 0)),              # blstm
            pl.BlockSpec((H, H4), lambda b: (0, 0)),              # whh (permuted)
            pl.BlockSpec((1, P * N, Fin), lambda b: (b, 0, 0)),   # xs (p,n) rows
            pl.BlockSpec((Fin, G2), lambda b: (0, 0)),            # wr
            pl.BlockSpec((1, G2), lambda b: (0, 0)),              # br
            pl.BlockSpec((P, G2), lambda b: (0, 0)),              # fcw (bcast)
            pl.BlockSpec((P, G2), lambda b: (0, 0)),              # fcb (bcast)
            pl.BlockSpec((1, G2), lambda b: (0, 0)),              # gamma
            pl.BlockSpec((1, G2), lambda b: (0, 0)),              # beta
            pl.BlockSpec((P, G2, P), lambda b: (0, 0, 0)),        # wf (p_in,C,p_out)
            pl.BlockSpec((1, P), lambda b: (0, 0)),               # bf
        ],
        out_specs=pl.BlockSpec((1, N, P), lambda b: (b, 0, 0)),
        scratch_shapes=[pltpu.VMEM((T, N, H4), jnp.float32)],     # xproj stage
        compiler_params=pltpu.CompilerParams(
            dimension_semantics=("parallel",)),
    )(x_tn, adj, params["w1"], params["b1"].reshape(1, G1),
      params["w2"], params["b2"].reshape(1, G2),
      wih, blstm, whh,
      xs, params["wr"], params["br"].reshape(1, G2),
      fcw_bc, fcb_bc,
      params["gamma"].reshape(1, G2), params["beta"].reshape(1, G2),
      wf2, params["bf"].reshape(1, P))
    return pred[..., None]                                         # (B,N,P,1)


# ----------------------------------------------------------------------------
# Pure-JAX reference (same math, original gate order) for verification.
# ----------------------------------------------------------------------------
def reference_forward(x, adj, params, *, pre_len):
    B, N, T, Fin = x.shape
    H = params["whh"].shape[0]
    xb = jnp.transpose(x, (0, 2, 1, 3))
    ax = jnp.einsum("ij,btjf->btif", adj, xb)
    h1 = jax.nn.relu(ax @ params["w1"] + params["b1"])
    ah = jnp.einsum("ij,btjf->btif", adj, h1)
    gcn = ah @ params["w2"] + params["b2"]
    seq = jnp.transpose(gcn, (1, 0, 2, 3)).reshape(T, B * N, -1)
    h = jnp.zeros((B * N, H), jnp.float32)
    c = jnp.zeros((B * N, H), jnp.float32)
    for t in range(T):
        gates = seq[t] @ params["wih"] + h @ params["whh"] + params["blstm"]
        i = jax.nn.sigmoid(gates[:, :H])
        f = jax.nn.sigmoid(gates[:, H:2 * H])
        g = jnp.tanh(gates[:, 2 * H:3 * H])
        o = jax.nn.sigmoid(gates[:, 3 * H:])
        c = f * c + i * g
        h = o * jnp.tanh(c)
    gru_last = h.reshape(B, N, H)
    s = T // pre_len
    xs = x[:, :, ::s, :]
    res = xs @ params["wr"] + params["br"]
    tout = (gru_last[:, :, None, :] * params["fcw"][None, None, :, None]
            + params["fcb"][None, None, :, None])
    v = jax.nn.relu(res + tout)
    mean = v.mean(-1, keepdims=True)
    var = ((v - mean) ** 2).mean(-1, keepdims=True)
    x_ln = (v - mean) / jnp.sqrt(var + 1e-5) * params["gamma"] + params["beta"]
    pred = jnp.einsum("bnik,pik->bnp", x_ln, params["wf"]) + params["bf"]
    return pred[..., None]


if __name__ == "__main__":
    key = jax.random.PRNGKey(0)
    B, N, T, Fin = 2, 8, 8, 4
    G1, G2, H, P = 16, 32, 32, 2          # time_step // pre_len = stride = 4
    keys = jax.random.split(key, 16)

    def rnd(k, shape, scale=0.1):
        return (scale * jax.random.normal(k, shape)).astype(jnp.float32)

    params = dict(
        w1=rnd(keys[0], (Fin, G1)), b1=rnd(keys[1], (G1,)),
        w2=rnd(keys[2], (G1, G2)), b2=rnd(keys[3], (G2,)),
        wih=rnd(keys[4], (G2, 4 * H)), whh=rnd(keys[5], (H, 4 * H)),
        blstm=(rnd(keys[6], (4 * H,)) + rnd(keys[7], (4 * H,))),
        wr=rnd(keys[8], (Fin, G2)), br=rnd(keys[9], (G2,)),
        fcw=rnd(keys[10], (P,)), fcb=rnd(keys[11], (P,)),
        gamma=jnp.ones((G2,), jnp.float32), beta=jnp.zeros((G2,), jnp.float32),
        wf=rnd(keys[12], (P, P, G2)), bf=rnd(keys[13], (P,)),
    )

    x = jax.random.normal(keys[14], (B, N, T, Fin), dtype=jnp.float32)
    adj_raw = jax.random.uniform(keys[15], (N, N), dtype=jnp.float32)
    adj = adj_raw / jnp.sum(adj_raw, axis=1, keepdims=True)

    out = am_lstm_gcn_forward(x, adj, params, pre_len=P)
    out = jax.block_until_ready(out)
    assert out.shape == (B, N, P, 1)

    ref = reference_forward(x, adj, params, pre_len=P)
    np.testing.assert_allclose(np.asarray(out), np.asarray(ref),
                               rtol=2e-4, atol=2e-4)
    print("KERNEL_OK")
</pallas_src>

<mosaic_0001>
module attributes {stable_mosaic.version = 11 : i64} {
  func.func @fused_am_lstm_gcn_kernel(%arg0: i32, %arg1: memref<1x64x4xf32, #tpu.memory_space<vmem>>, %arg2: memref<8x8xf32, #tpu.memory_space<vmem>>, %arg3: memref<4x16xf32, #tpu.memory_space<vmem>>, %arg4: memref<1x16xf32, #tpu.memory_space<vmem>>, %arg5: memref<16x32xf32, #tpu.memory_space<vmem>>, %arg6: memref<1x32xf32, #tpu.memory_space<vmem>>, %arg7: memref<32x128xf32, #tpu.memory_space<vmem>>, %arg8: memref<1x128xf32, #tpu.memory_space<vmem>>, %arg9: memref<32x128xf32, #tpu.memory_space<vmem>>, %arg10: memref<1x16x4xf32, #tpu.memory_space<vmem>>, %arg11: memref<4x32xf32, #tpu.memory_space<vmem>>, %arg12: memref<1x32xf32, #tpu.memory_space<vmem>>, %arg13: memref<2x32xf32, #tpu.memory_space<vmem>>, %arg14: memref<2x32xf32, #tpu.memory_space<vmem>>, %arg15: memref<1x32xf32, #tpu.memory_space<vmem>>, %arg16: memref<1x32xf32, #tpu.memory_space<vmem>>, %arg17: memref<2x32x2xf32, #tpu.memory_space<vmem>>, %arg18: memref<1x2xf32, #tpu.memory_space<vmem>>, %arg19: memref<1x8x2xf32, #tpu.memory_space<vmem>>, %arg20: memref<8x8x128xf32, #tpu.memory_space<vmem>>) attributes {dimension_semantics = [#tpu.dimension_semantics<parallel>], iteration_bounds = array<i64: 2>, scalar_prefetch = 0 : i64, scratch_operands = 1 : i64, tpu.core_type = #tpu.core_type<tc>, window_params = [{transform_indices = @transform_0, window_bounds = array<i64: 1, 64, 4>}, {pipeline_mode = #tpu.pipeline_mode<synchronous>, transform_indices = @transform_1, window_bounds = array<i64: 8, 8>}, {pipeline_mode = #tpu.pipeline_mode<synchronous>, transform_indices = @transform_2, window_bounds = array<i64: 4, 16>}, {pipeline_mode = #tpu.pipeline_mode<synchronous>, transform_indices = @transform_3, window_bounds = array<i64: 1, 16>}, {pipeline_mode = #tpu.pipeline_mode<synchronous>, transform_indices = @transform_4, window_bounds = array<i64: 16, 32>}, {pipeline_mode = #tpu.pipeline_mode<synchronous>, transform_indices = @transform_5, window_bounds = array<i64: 1, 32>}, {pipeline_mode = #tpu.pipeline_mode<synchronous>, transform_indices = @transform_6, window_bounds = array<i64: 32, 128>}, {pipeline_mode = #tpu.pipeline_mode<synchronous>, transform_indices = @transform_7, window_bounds = array<i64: 1, 128>}, {pipeline_mode = #tpu.pipeline_mode<synchronous>, transform_indices = @transform_8, window_bounds = array<i64: 32, 128>}, {transform_indices = @transform_9, window_bounds = array<i64: 1, 16, 4>}, {pipeline_mode = #tpu.pipeline_mode<synchronous>, transform_indices = @transform_10, window_bounds = array<i64: 4, 32>}, {pipeline_mode = #tpu.pipeline_mode<synchronous>, transform_indices = @transform_11, window_bounds = array<i64: 1, 32>}, {pipeline_mode = #tpu.pipeline_mode<synchronous>, transform_indices = @transform_12, window_bounds = array<i64: 2, 32>}, {pipeline_mode = #tpu.pipeline_mode<synchronous>, transform_indices = @transform_13, window_bounds = array<i64: 2, 32>}, {pipeline_mode = #tpu.pipeline_mode<synchronous>, transform_indices = @transform_14, window_bounds = array<i64: 1, 32>}, {pipeline_mode = #tpu.pipeline_mode<synchronous>, transform_indices = @transform_15, window_bounds = array<i64: 1, 32>}, {pipeline_mode = #tpu.pipeline_mode<synchronous>, transform_indices = @transform_16, window_bounds = array<i64: 2, 32, 2>}, {pipeline_mode = #tpu.pipeline_mode<synchronous>, transform_indices = @transform_17, window_bounds = array<i64: 1, 2>}, {transform_indices = @transform_18, window_bounds = array<i64: 1, 8, 2>}]} {
    %c0 = arith.constant 0 : index
    %c0_0 = arith.constant 0 : index
    %0 = vector.load %arg2[%c0, %c0_0] : memref<8x8xf32, #tpu.memory_space<vmem>>, vector<8x8xf32>
    %1 = vector.shape_cast %0 : vector<8x8xf32> to vector<1x8x8xf32>
    %2 = vector.broadcast %1 : vector<1x8x8xf32> to vector<8x8x8xf32>
    %c0_1 = arith.constant 0 : index
    %c0_2 = arith.constant 0 : index
    %c0_3 = arith.constant 0 : index
    %3 = vector.load %arg1[%c0_1, %c0_2, %c0_3] : memref<1x64x4xf32, #tpu.memory_space<vmem>>, vector<1x64x4xf32>
    %4 = vector.shape_cast %3 : vector<1x64x4xf32> to vector<64x4xf32>
    %c0_4 = arith.constant 0 : index
    %c0_5 = arith.constant 0 : index
    %5 = vector.load %arg3[%c0_4, %c0_5] : memref<4x16xf32, #tpu.memory_space<vmem>>, vector<4x16xf32>
    %cst = arith.constant dense<0.000000e+00> : vector<64x16xf32>
    %6 = tpu.matmul %4, %5, %cst {dimension_numbers = #tpu.dot_dimension_numbers<[1], [0], [0], [1], [0, 0, 1, 1], [], []>} : vector<64x4xf32>, vector<4x16xf32>, vector<64x16xf32> -> vector<64x16xf32>
    %7 = vector.shape_cast %6 : vector<64x16xf32> to vector<8x8x16xf32>
    "tpu.trace_start"() <{level = 10 : i32, message = "tij,tjg->tig"}> : () -> ()
    %cst_6 = arith.constant dense<0.000000e+00> : vector<8x8x16xf32>
    %8 = tpu.matmul %2, %7, %cst_6 {dimension_numbers = #tpu.dot_dimension_numbers<[2], [1], [1], [2], [0, 0, 0, 1, 1, 2], [0], [0]>} : vector<8x8x8xf32>, vector<8x8x16xf32>, vector<8x8x16xf32> -> vector<8x8x16xf32>
    "tpu.trace_stop"() : () -> ()
    %c0_7 = arith.constant 0 : index
    %c0_8 = arith.constant 0 : index
    %9 = vector.load %arg4[%c0_7, %c0_8] : memref<1x16xf32, #tpu.memory_space<vmem>>, vector<1x16xf32>
    %10 = vector.shape_cast %9 : vector<1x16xf32> to vector<1x1x16xf32>
    %11 = vector.broadcast %10 : vector<1x1x16xf32> to vector<8x8x16xf32>
    %12 = arith.addf %8, %11 : vector<8x8x16xf32>
    %cst_9 = arith.constant 0.000000e+00 : f32
    %13 = vector.broadcast %cst_9 : f32 to vector<8x8x16xf32>
    %14 = arith.maximumf %12, %13 : vector<8x8x16xf32>
    %15 = vector.shape_cast %14 : vector<8x8x16xf32> to vector<64x16xf32>
    %c0_10 = arith.constant 0 : index
    %c0_11 = arith.constant 0 : index
    %16 = vector.load %arg5[%c0_10, %c0_11] : memref<16x32xf32, #tpu.memory_space<vmem>>, vector<16x32xf32>
    %cst_12 = arith.constant dense<0.000000e+00> : vector<64x32xf32>
    %17 = tpu.matmul %15, %16, %cst_12 {dimension_numbers = #tpu.dot_dimension_numbers<[1], [0], [0], [1], [0, 0, 1, 1], [], []>} : vector<64x16xf32>, vector<16x32xf32>, vector<64x32xf32> -> vector<64x32xf32>
    %18 = vector.shape_cast %17 : vector<64x32xf32> to vector<8x8x32xf32>
    "tpu.trace_start"() <{level = 10 : i32, message = "tij,tjg->tig"}> : () -> ()
    %cst_13 = arith.constant dense<0.000000e+00> : vector<8x8x32xf32>
    %19 = tpu.matmul %2, %18, %cst_13 {dimension_numbers = #tpu.dot_dimension_numbers<[2], [1], [1], [2], [0, 0, 0, 1, 1, 2], [0], [0]>} : vector<8x8x8xf32>, vector<8x8x32xf32>, vector<8x8x32xf32> -> vector<8x8x32xf32>
    "tpu.trace_stop"() : () -> ()
    %c0_14 = arith.constant 0 : index
    %c0_15 = arith.constant 0 : index
    %20 = vector.load %arg6[%c0_14, %c0_15] : memref<1x32xf32, #tpu.memory_space<vmem>>, vector<1x32xf32>
    %21 = vector.shape_cast %20 : vector<1x32xf32> to vector<1x1x32xf32>
    %22 = vector.broadcast %21 : vector<1x1x32xf32> to vector<8x8x32xf32>
    %23 = arith.addf %19, %22 : vector<8x8x32xf32>
    %24 = vector.shape_cast %23 : vector<8x8x32xf32> to vector<64x32xf32>
    %c0_16 = arith.constant 0 : index
    %c0_17 = arith.constant 0 : index
    %25 = vector.load %arg7[%c0_16, %c0_17] : memref<32x128xf32, #tpu.memory_space<vmem>>, vector<32x128xf32>
    %cst_18 = arith.constant dense<0.000000e+00> : vector<64x128xf32>
    %26 = tpu.matmul %24, %25, %cst_18 {dimension_numbers = #tpu.dot_dimension_numbers<[1], [0], [0], [1], [0, 0, 1, 1], [], []>} : vector<64x32xf32>, vector<32x128xf32>, vector<64x128xf32> -> vector<64x128xf32>
    %c0_19 = arith.constant 0 : index
    %c0_20 = arith.constant 0 : index
    %27 = vector.load %arg8[%c0_19, %c0_20] : memref<1x128xf32, #tpu.memory_space<vmem>>, vector<1x128xf32>
    %28 = vector.broadcast %27 : vector<1x128xf32> to vector<64x128xf32>
    %29 = arith.addf %26, %28 : vector<64x128xf32>
    %30 = vector.shape_cast %29 : vector<64x128xf32> to vector<8x8x128xf32>
    %c0_21 = arith.constant 0 : index
    %c0_22 = arith.constant 0 : index
    %c0_23 = arith.constant 0 : index
    %31 = vector.load %arg20[%c0_21, %c0_22, %c0_23] : memref<8x8x128xf32, #tpu.memory_space<vmem>>, vector<8x8x128xf32>
    tpu.vector_store %arg20[%c0_21, %c0_22, %c0_23], %30 {strides = array<i32>} : memref<8x8x128xf32, #tpu.memory_space<vmem>>, vector<8x8x128xf32>,
    %c0_24 = arith.constant 0 : index
    %c0_25 = arith.constant 0 : index
    %32 = vector.load %arg9[%c0_24, %c0_25] : memref<32x128xf32, #tpu.memory_space<vmem>>, vector<32x128xf32>
    %cst_26 = arith.constant 0.000000e+00 : f32
    %33 = vector.broadcast %cst_26 : f32 to vector<8x32xf32>
    %cst_27 = arith.constant 0.000000e+00 : f32
    %34 = vector.broadcast %cst_27 : f32 to vector<8x32xf32>
    %c0_i32 = arith.constant 0 : i32
    %35 = arith.index_cast %c0_i32 : i32 to index
    %c0_28 = arith.constant 0 : index
    %c0_29 = arith.constant 0 : index
    %36 = vector.load %arg20[%35, %c0_28, %c0_29] : memref<8x8x128xf32, #tpu.memory_space<vmem>>, vector<1x8x128xf32>
    %37 = vector.shape_cast %36 : vector<1x8x128xf32> to vector<8x128xf32>
    %cst_30 = arith.constant dense<0.000000e+00> : vector<8x128xf32>
    %38 = tpu.matmul %33, %32, %cst_30 {dimension_numbers = #tpu.dot_dimension_numbers<[1], [0], [0], [1], [0, 0, 1, 1], [], []>} : vector<8x32xf32>, vector<32x128xf32>, vector<8x128xf32> -> vector<8x128xf32>
    %39 = arith.addf %37, %38 : vector<8x128xf32>
    %40 = vector.extract_strided_slice %39 {offsets = [0, 0], sizes = [8, 96], strides = [1, 1]} : vector<8x128xf32> to vector<8x96xf32>
    %41 = arith.negf %40 : vector<8x96xf32>
    %42 = math.exp %41 : vector<8x96xf32>
    %cst_31 = arith.constant 1.000000e+00 : f32
    %43 = vector.broadcast %cst_31 : f32 to vector<8x96xf32>
    %44 = arith.addf %43, %42 : vector<8x96xf32>
    %45 = arith.divf %43, %44 : vector<8x96xf32>
    %46 = vector.extract_strided_slice %39 {offsets = [0, 96], sizes = [8, 32], strides = [1, 1]} : vector<8x128xf32> to vector<8x32xf32>
    %47 = math.tanh %46 : vector<8x32xf32>
    %48 = vector.extract_strided_slice %45 {offsets = [0, 32], sizes = [8, 32], strides = [1, 1]} : vector<8x96xf32> to vector<8x32xf32>
    %49 = arith.mulf %48, %34 : vector<8x32xf32>
    %50 = vector.extract_strided_slice %45 {offsets = [0, 0], sizes = [8, 32], strides = [1, 1]} : vector<8x96xf32> to vector<8x32xf32>
    %51 = arith.mulf %50, %47 : vector<8x32xf32>
    %52 = arith.addf %49, %51 : vector<8x32xf32>
    %53 = vector.extract_strided_slice %45 {offsets = [0, 64], sizes = [8, 32], strides = [1, 1]} : vector<8x96xf32> to vector<8x32xf32>
    %54 = math.tanh %52 : vector<8x32xf32>
    %55 = arith.mulf %53, %54 : vector<8x32xf32>
    %c1_i32 = arith.constant 1 : i32
    %56 = arith.index_cast %c1_i32 : i32 to index
    %c0_32 = arith.constant 0 : index
    %c0_33 = arith.constant 0 : index
    %57 = vector.load %arg20[%56, %c0_32, %c0_33] : memref<8x8x128xf32, #tpu.memory_space<vmem>>, vector<1x8x128xf32>
    %58 = vector.shape_cast %57 : vector<1x8x128xf32> to vector<8x128xf32>
    %cst_34 = arith.constant dense<0.000000e+00> : vector<8x128xf32>
    %59 = tpu.matmul %55, %32, %cst_34 {dimension_numbers = #tpu.dot_dimension_numbers<[1], [0], [0], [1], [0, 0, 1, 1], [], []>} : vector<8x32xf32>, vector<32x128xf32>, vector<8x128xf32> -> vector<8x128xf32>
    %60 = arith.addf %58, %59 : vector<8x128xf32>
    %61 = vector.extract_strided_slice %60 {offsets = [0, 0], sizes = [8, 96], strides = [1, 1]} : vector<8x128xf32> to vector<8x96xf32>
    %62 = arith.negf %61 : vector<8x96xf32>
    %63 = math.exp %62 : vector<8x96xf32>
    %cst_35 = arith.constant 1.000000e+00 : f32
    %64 = vector.broadcast %cst_35 : f32 to vector<8x96xf32>
    %65 = arith.addf %64, %63 : vector<8x96xf32>
    %66 = arith.divf %64, %65 : vector<8x96xf32>
    %67 = vector.extract_strided_slice %60 {offsets = [0, 96], sizes = [8, 32], strides = [1, 1]} : vector<8x128xf32> to vector<8x32xf32>
    %68 = math.tanh %67 : vector<8x32xf32>
    %69 = vector.extract_strided_slice %66 {offsets = [0, 32], sizes = [8, 32], strides = [1, 1]} : vector<8x96xf32> to vector<8x32xf32>
    %70 = arith.mulf %69, %52 : vector<8x32xf32>
    %71 = vector.extract_strided_slice %66 {offsets = [0, 0], sizes = [8, 32], strides = [1, 1]} : vector<8x96xf32> to vector<8x32xf32>
    %72 = arith.mulf %71, %68 : vector<8x32xf32>
    %73 = arith.addf %70, %72 : vector<8x32xf32>
    %74 = vector.extract_strided_slice %66 {offsets = [0, 64], sizes = [8, 32], strides = [1, 1]} : vector<8x96xf32> to vector<8x32xf32>
    %75 = math.tanh %73 : vector<8x32xf32>
    %76 = arith.mulf %74, %75 : vector<8x32xf32>
    %c2_i32 = arith.constant 2 : i32
    %77 = arith.index_cast %c2_i32 : i32 to index
    %c0_36 = arith.constant 0 : index
    %c0_37 = arith.constant 0 : index
    %78 = vector.load %arg20[%77, %c0_36, %c0_37] : memref<8x8x128xf32, #tpu.memory_space<vmem>>, vector<1x8x128xf32>
    %79 = vector.shape_cast %78 : vector<1x8x128xf32> to vector<8x128xf32>
    %cst_38 = arith.constant dense<0.000000e+00> : vector<8x128xf32>
    %80 = tpu.matmul %76, %32, %cst_38 {dimension_numbers = #tpu.dot_dimension_numbers<[1], [0], [0], [1], [0, 0, 1, 1], [], []>} : vector<8x32xf32>, vector<32x128xf32>, vector<8x128xf32> -> vector<8x128xf32>
    %81 = arith.addf %79, %80 : vector<8x128xf32>
    %82 = vector.extract_strided_slice %81 {offsets = [0, 0], sizes = [8, 96], strides = [1, 1]} : vector<8x128xf32> to vector<8x96xf32>
    %83 = arith.negf %82 : vector<8x96xf32>
    %84 = math.exp %83 : vector<8x96xf32>
    %cst_39 = arith.constant 1.000000e+00 : f32
    %85 = vector.broadcast %cst_39 : f32 to vector<8x96xf32>
    %86 = arith.addf %85, %84 : vector<8x96xf32>
    %87 = arith.divf %85, %86 : vector<8x96xf32>
    %88 = vector.extract_strided_slice %81 {offsets = [0, 96], sizes = [8, 32], strides = [1, 1]} : vector<8x128xf32> to vector<8x32xf32>
    %89 = math.tanh %88 : vector<8x32xf32>
    %90 = vector.extract_strided_slice %87 {offsets = [0, 32], sizes = [8, 32], strides = [1, 1]} : vector<8x96xf32> to vector<8x32xf32>
    %91 = arith.mulf %90, %73 : vector<8x32xf32>
    %92 = vector.extract_strided_slice %87 {offsets = [0, 0], sizes = [8, 32], strides = [1, 1]} : vector<8x96xf32> to vector<8x32xf32>
    %93 = arith.mulf %92, %89 : vector<8x32xf32>
    %94 = arith.addf %91, %93 : vector<8x32xf32>
    %95 = vector.extract_strided_slice %87 {offsets = [0, 64], sizes = [8, 32], strides = [1, 1]} : vector<8x96xf32> to vector<8x32xf32>
    %96 = math.tanh %94 : vector<8x32xf32>
    %97 = arith.mulf %95, %96 : vector<8x32xf32>
    %c3_i32 = arith.constant 3 : i32
    %98 = arith.index_cast %c3_i32 : i32 to index
    %c0_40 = arith.constant 0 : index
    %c0_41 = arith.constant 0 : index
    %99 = vector.load %arg20[%98, %c0_40, %c0_41] : memref<8x8x128xf32, #tpu.memory_space<vmem>>, vector<1x8x128xf32>
    %100 = vector.shape_cast %99 : vector<1x8x128xf32> to vector<8x128xf32>
    %cst_42 = arith.constant dense<0.000000e+00> : vector<8x128xf32>
    %101 = tpu.matmul %97, %32, %cst_42 {dimension_numbers = #tpu.dot_dimension_numbers<[1], [0], [0], [1], [0, 0, 1, 1], [], []>} : vector<8x32xf32>, vector<32x128xf32>, vector<8x128xf32> -> vector<8x128xf32>
    %102 = arith.addf %100, %101 : vector<8x128xf32>
    %103 = vector.extract_strided_slice %102 {offsets = [0, 0], sizes = [8, 96], strides = [1, 1]} : vector<8x128xf32> to vector<8x96xf32>
    %104 = arith.negf %103 : vector<8x96xf32>
    %105 = math.exp %104 : vector<8x96xf32>
    %cst_43 = arith.constant 1.000000e+00 : f32
    %106 = vector.broadcast %cst_43 : f32 to vector<8x96xf32>
    %107 = arith.addf %106, %105 : vector<8x96xf32>
    %108 = arith.divf %106, %107 : vector<8x96xf32>
    %109 = vector.extract_strided_slice %102 {offsets = [0, 96], sizes = [8, 32], strides = [1, 1]} : vector<8x128xf32> to vector<8x32xf32>
    %110 = math.tanh %109 : vector<8x32xf32>
    %111 = vector.extract_strided_slice %108 {offsets = [0, 32], sizes = [8, 32], strides = [1, 1]} : vector<8x96xf32> to vector<8x32xf32>
    %112 = arith.mulf %111, %94 : vector<8x32xf32>
    %113 = vector.extract_strided_slice %108 {offsets = [0, 0], sizes = [8, 32], strides = [1, 1]} : vector<8x96xf32> to vector<8x32xf32>
    %114 = arith.mulf %113, %110 : vector<8x32xf32>
    %115 = arith.addf %112, %114 : vector<8x32xf32>
    %116 = vector.extract_strided_slice %108 {offsets = [0, 64], sizes = [8, 32], strides = [1, 1]} : vector<8x96xf32> to vector<8x32xf32>
    %117 = math.tanh %115 : vector<8x32xf32>
    %118 = arith.mulf %116, %117 : vector<8x32xf32>
    %c4_i32 = arith.constant 4 : i32
    %119 = arith.index_cast %c4_i32 : i32 to index
    %c0_44 = arith.constant 0 : index
    %c0_45 = arith.constant 0 : index
    %120 = vector.load %arg20[%119, %c0_44, %c0_45] : memref<8x8x128xf32, #tpu.memory_space<vmem>>, vector<1x8x128xf32>
    %121 = vector.shape_cast %120 : vector<1x8x128xf32> to vector<8x128xf32>
    %cst_46 = arith.constant dense<0.000000e+00> : vector<8x128xf32>
    %122 = tpu.matmul %118, %32, %cst_46 {dimension_numbers = #tpu.dot_dimension_numbers<[1], [0], [0], [1], [0, 0, 1, 1], [], []>} : vector<8x32xf32>, vector<32x128xf32>, vector<8x128xf32> -> vector<8x128xf32>
    %123 = arith.addf %121, %122 : vector<8x128xf32>
    %124 = vector.extract_strided_slice %123 {offsets = [0, 0], sizes = [8, 96], strides = [1, 1]} : vector<8x128xf32> to vector<8x96xf32>
    %125 = arith.negf %124 : vector<8x96xf32>
    %126 = math.exp %125 : vector<8x96xf32>
    %cst_47 = arith.constant 1.000000e+00 : f32
    %127 = vector.broadcast %cst_47 : f32 to vector<8x96xf32>
    %128 = arith.addf %127, %126 : vector<8x96xf32>
    %129 = arith.divf %127, %128 : vector<8x96xf32>
    %130 = vector.extract_strided_slice %123 {offsets = [0, 96], sizes = [8, 32], strides = [1, 1]} : vector<8x128xf32> to vector<8x32xf32>
    %131 = math.tanh %130 : vector<8x32xf32>
    %132 = vector.extract_strided_slice %129 {offsets = [0, 32], sizes = [8, 32], strides = [1, 1]} : vector<8x96xf32> to vector<8x32xf32>
    %133 = arith.mulf %132, %115 : vector<8x32xf32>
    %134 = vector.extract_strided_slice %129 {offsets = [0, 0], sizes = [8, 32], strides = [1, 1]} : vector<8x96xf32> to vector<8x32xf32>
    %135 = arith.mulf %134, %131 : vector<8x32xf32>
    %136 = arith.addf %133, %135 : vector<8x32xf32>
    %137 = vector.extract_strided_slice %129 {offsets = [0, 64], sizes = [8, 32], strides = [1, 1]} : vector<8x96xf32> to vector<8x32xf32>
    %138 = math.tanh %136 : vector<8x32xf32>
    %139 = arith.mulf %137, %138 : vector<8x32xf32>
    %c5_i32 = arith.constant 5 : i32
    %140 = arith.index_cast %c5_i32 : i32 to index
    %c0_48 = arith.constant 0 : index
    %c0_49 = arith.constant 0 : index
    %141 = vector.load %arg20[%140, %c0_48, %c0_49] : memref<8x8x128xf32, #tpu.memory_space<vmem>>, vector<1x8x128xf32>
    %142 = vector.shape_cast %141 : vector<1x8x128xf32> to vector<8x128xf32>
    %cst_50 = arith.constant dense<0.000000e+00> : vector<8x128xf32>
    %143 = tpu.matmul %139, %32, %cst_50 {dimension_numbers = #tpu.dot_dimension_numbers<[1], [0], [0], [1], [0, 0, 1, 1], [], []>} : vector<8x32xf32>, vector<32x128xf32>, vector<8x128xf32> -> vector<8x128xf32>
    %144 = arith.addf %142, %143 : vector<8x128xf32>
    %145 = vector.extract_strided_slice %144 {offsets = [0, 0], sizes = [8, 96], strides = [1, 1]} : vector<8x128xf32> to vector<8x96xf32>
    %146 = arith.negf %145 : vector<8x96xf32>
    %147 = math.exp %146 : vector<8x96xf32>
    %cst_51 = arith.constant 1.000000e+00 : f32
    %148 = vector.broadcast %cst_51 : f32 to vector<8x96xf32>
    %149 = arith.addf %148, %147 : vector<8x96xf32>
    %150 = arith.divf %148, %149 : vector<8x96xf32>
    %151 = vector.extract_strided_slice %144 {offsets = [0, 96], sizes = [8, 32], strides = [1, 1]} : vector<8x128xf32> to vector<8x32xf32>
    %152 = math.tanh %151 : vector<8x32xf32>
    %153 = vector.extract_strided_slice %150 {offsets = [0, 32], sizes = [8, 32], strides = [1, 1]} : vector<8x96xf32> to vector<8x32xf32>
    %154 = arith.mulf %153, %136 : vector<8x32xf32>
    %155 = vector.extract_strided_slice %150 {offsets = [0, 0], sizes = [8, 32], strides = [1, 1]} : vector<8x96xf32> to vector<8x32xf32>
    %156 = arith.mulf %155, %152 : vector<8x32xf32>
    %157 = arith.addf %154, %156 : vector<8x32xf32>
    %158 = vector.extract_strided_slice %150 {offsets = [0, 64], sizes = [8, 32], strides = [1, 1]} : vector<8x96xf32> to vector<8x32xf32>
    %159 = math.tanh %157 : vector<8x32xf32>
    %160 = arith.mulf %158, %159 : vector<8x32xf32>
    %c6_i32 = arith.constant 6 : i32
    %161 = arith.index_cast %c6_i32 : i32 to index
    %c0_52 = arith.constant 0 : index
    %c0_53 = arith.constant 0 : index
    %162 = vector.load %arg20[%161, %c0_52, %c0_53] : memref<8x8x128xf32, #tpu.memory_space<vmem>>, vector<1x8x128xf32>
    %163 = vector.shape_cast %162 : vector<1x8x128xf32> to vector<8x128xf32>
    %cst_54 = arith.constant dense<0.000000e+00> : vector<8x128xf32>
    %164 = tpu.matmul %160, %32, %cst_54 {dimension_numbers = #tpu.dot_dimension_numbers<[1], [0], [0], [1], [0, 0, 1, 1], [], []>} : vector<8x32xf32>, vector<32x128xf32>, vector<8x128xf32> -> vector<8x128xf32>
    %165 = arith.addf %163, %164 : vector<8x128xf32>
    %166 = vector.extract_strided_slice %165 {offsets = [0, 0], sizes = [8, 96], strides = [1, 1]} : vector<8x128xf32> to vector<8x96xf32>
    %167 = arith.negf %166 : vector<8x96xf32>
    %168 = math.exp %167 : vector<8x96xf32>
    %cst_55 = arith.constant 1.000000e+00 : f32
    %169 = vector.broadcast %cst_55 : f32 to vector<8x96xf32>
    %170 = arith.addf %169, %168 : vector<8x96xf32>
    %171 = arith.divf %169, %170 : vector<8x96xf32>
    %172 = vector.extract_strided_slice %165 {offsets = [0, 96], sizes = [8, 32], strides = [1, 1]} : vector<8x128xf32> to vector<8x32xf32>
    %173 = math.tanh %172 : vector<8x32xf32>
    %174 = vector.extract_strided_slice %171 {offsets = [0, 32], sizes = [8, 32], strides = [1, 1]} : vector<8x96xf32> to vector<8x32xf32>
    %175 = arith.mulf %174, %157 : vector<8x32xf32>
    %176 = vector.extract_strided_slice %171 {offsets = [0, 0], sizes = [8, 32], strides = [1, 1]} : vector<8x96xf32> to vector<8x32xf32>
    %177 = arith.mulf %176, %173 : vector<8x32xf32>
    %178 = arith.addf %175, %177 : vector<8x32xf32>
    %179 = vector.extract_strided_slice %171 {offsets = [0, 64], sizes = [8, 32], strides = [1, 1]} : vector<8x96xf32> to vector<8x32xf32>
    %180 = math.tanh %178 : vector<8x32xf32>
    %181 = arith.mulf %179, %180 : vector<8x32xf32>
    %c7_i32 = arith.constant 7 : i32
    %182 = arith.index_cast %c7_i32 : i32 to index
    %c0_56 = arith.constant 0 : index
    %c0_57 = arith.constant 0 : index
    %183 = vector.load %arg20[%182, %c0_56, %c0_57] : memref<8x8x128xf32, #tpu.memory_space<vmem>>, vector<1x8x128xf32>
    %184 = vector.shape_cast %183 : vector<1x8x128xf32> to vector<8x128xf32>
    %cst_58 = arith.constant dense<0.000000e+00> : vector<8x128xf32>
    %185 = tpu.matmul %181, %32, %cst_58 {dimension_numbers = #tpu.dot_dimension_numbers<[1], [0], [0], [1], [0, 0, 1, 1], [], []>} : vector<8x32xf32>, vector<32x128xf32>, vector<8x128xf32> -> vector<8x128xf32>
    %186 = arith.addf %184, %185 : vector<8x128xf32>
    %187 = vector.extract_strided_slice %186 {offsets = [0, 0], sizes = [8, 96], strides = [1, 1]} : vector<8x128xf32> to vector<8x96xf32>
    %188 = arith.negf %187 : vector<8x96xf32>
    %189 = math.exp %188 : vector<8x96xf32>
    %cst_59 = arith.constant 1.000000e+00 : f32
    %190 = vector.broadcast %cst_59 : f32 to vector<8x96xf32>
    %191 = arith.addf %190, %189 : vector<8x96xf32>
    %192 = arith.divf %190, %191 : vector<8x96xf32>
    %193 = vector.extract_strided_slice %186 {offsets = [0, 96], sizes = [8, 32], strides = [1, 1]} : vector<8x128xf32> to vector<8x32xf32>
    %194 = math.tanh %193 : vector<8x32xf32>
    %195 = vector.extract_strided_slice %192 {offsets = [0, 32], sizes = [8, 32], strides = [1, 1]} : vector<8x96xf32> to vector<8x32xf32>
    %196 = arith.mulf %195, %178 : vector<8x32xf32>
    %197 = vector.extract_strided_slice %192 {offsets = [0, 0], sizes = [8, 32], strides = [1, 1]} : vector<8x96xf32> to vector<8x32xf32>
    %198 = arith.mulf %197, %194 : vector<8x32xf32>
    %199 = arith.addf %196, %198 : vector<8x32xf32>
    %200 = vector.extract_strided_slice %192 {offsets = [0, 64], sizes = [8, 32], strides = [1, 1]} : vector<8x96xf32> to vector<8x32xf32>
    %201 = math.tanh %199 : vector<8x32xf32>
    %202 = arith.mulf %200, %201 : vector<8x32xf32>
    %c8_i32 = arith.constant 8 : i32
    %c0_60 = arith.constant 0 : index
    %c0_61 = arith.constant 0 : index
    %c0_62 = arith.constant 0 : index
    %203 = vector.load %arg10[%c0_60, %c0_61, %c0_62] : memref<1x16x4xf32, #tpu.memory_space<vmem>>, vector<1x16x4xf32>
    %204 = vector.shape_cast %203 : vector<1x16x4xf32> to vector<16x4xf32>
    %c0_63 = arith.constant 0 : index
    %c0_64 = arith.constant 0 : index
    %205 = vector.load %arg11[%c0_63, %c0_64] : memref<4x32xf32, #tpu.memory_space<vmem>>, vector<4x32xf32>
    %cst_65 = arith.constant dense<0.000000e+00> : vector<16x32xf32>
    %206 = tpu.matmul %204, %205, %cst_65 {dimension_numbers = #tpu.dot_dimension_numbers<[1], [0], [0], [1], [0, 0, 1, 1], [], []>} : vector<16x4xf32>, vector<4x32xf32>, vector<16x32xf32> -> vector<16x32xf32>
    %c0_66 = arith.constant 0 : index
    %c0_67 = arith.constant 0 : index
    %207 = vector.load %arg12[%c0_66, %c0_67] : memref<1x32xf32, #tpu.memory_space<vmem>>, vector<1x32xf32>
    %208 = vector.broadcast %207 : vector<1x32xf32> to vector<16x32xf32>
    %209 = arith.addf %206, %208 : vector<16x32xf32>
    %210 = vector.shape_cast %209 : vector<16x32xf32> to vector<2x8x32xf32>
    %211 = vector.shape_cast %202 : vector<8x32xf32> to vector<1x8x32xf32>
    %c0_68 = arith.constant 0 : index
    %c0_69 = arith.constant 0 : index
    %212 = vector.load %arg13[%c0_68, %c0_69] : memref<2x32xf32, #tpu.memory_space<vmem>>, vector<2x32xf32>
    %213 = vector.shape_cast %212 : vector<2x32xf32> to vector<2x1x32xf32>
    %214 = vector.broadcast %211 : vector<1x8x32xf32> to vector<2x8x32xf32>
    %215 = vector.broadcast %213 : vector<2x1x32xf32> to vector<2x8x32xf32>
    %216 = arith.mulf %214, %215 : vector<2x8x32xf32>
    %c0_70 = arith.constant 0 : index
    %c0_71 = arith.constant 0 : index
    %217 = vector.load %arg14[%c0_70, %c0_71] : memref<2x32xf32, #tpu.memory_space<vmem>>, vector<2x32xf32>
    %218 = vector.shape_cast %217 : vector<2x32xf32> to vector<2x1x32xf32>
    %219 = vector.broadcast %218 : vector<2x1x32xf32> to vector<2x8x32xf32>
    %220 = arith.addf %216, %219 : vector<2x8x32xf32>
    %221 = arith.addf %210, %220 : vector<2x8x32xf32>
    %cst_72 = arith.constant 0.000000e+00 : f32
    %222 = vector.broadcast %cst_72 : f32 to vector<2x8x32xf32>
    %223 = arith.maximumf %221, %222 : vector<2x8x32xf32>
    %cst_73 = arith.constant dense<0.000000e+00> : vector<2x8xf32>
    %224 = vector.multi_reduction <add>, %223, %cst_73 [2] : vector<2x8x32xf32> to vector<2x8xf32>
    %225 = vector.shape_cast %224 : vector<2x8xf32> to vector<2x8x1xf32>
    %cst_74 = arith.constant 3.200000e+01 : f32
    %226 = vector.broadcast %cst_74 : f32 to vector<2x8x1xf32>
    %227 = arith.divf %225, %226 : vector<2x8x1xf32>
    %228 = vector.broadcast %227 : vector<2x8x1xf32> to vector<2x8x32xf32>
    %229 = arith.subf %223, %228 : vector<2x8x32xf32>
    %230 = arith.mulf %229, %229 : vector<2x8x32xf32>
    %cst_75 = arith.constant dense<0.000000e+00> : vector<2x8xf32>
    %231 = vector.multi_reduction <add>, %230, %cst_75 [2] : vector<2x8x32xf32> to vector<2x8xf32>
    %232 = vector.shape_cast %231 : vector<2x8xf32> to vector<2x8x1xf32>
    %cst_76 = arith.constant 3.200000e+01 : f32
    %233 = vector.broadcast %cst_76 : f32 to vector<2x8x1xf32>
    %234 = arith.divf %232, %233 : vector<2x8x1xf32>
    %235 = vector.broadcast %227 : vector<2x8x1xf32> to vector<2x8x32xf32>
    %236 = arith.subf %223, %235 : vector<2x8x32xf32>
    %cst_77 = arith.constant 9.99999974E-6 : f32
    %237 = vector.broadcast %cst_77 : f32 to vector<2x8x1xf32>
    %238 = arith.addf %234, %237 : vector<2x8x1xf32>
    %239 = math.rsqrt %238 : vector<2x8x1xf32>
    %240 = vector.broadcast %239 : vector<2x8x1xf32> to vector<2x8x32xf32>
    %241 = arith.mulf %236, %240 : vector<2x8x32xf32>
    %c0_78 = arith.constant 0 : index
    %c0_79 = arith.constant 0 : index
    %242 = vector.load %arg15[%c0_78, %c0_79] : memref<1x32xf32, #tpu.memory_space<vmem>>, vector<1x32xf32>
    %243 = vector.shape_cast %242 : vector<1x32xf32> to vector<1x1x32xf32>
    %244 = vector.broadcast %243 : vector<1x1x32xf32> to vector<2x8x32xf32>
    %245 = arith.mulf %241, %244 : vector<2x8x32xf32>
    %c0_80 = arith.constant 0 : index
    %c0_81 = arith.constant 0 : index
    %246 = vector.load %arg16[%c0_80, %c0_81] : memref<1x32xf32, #tpu.memory_space<vmem>>, vector<1x32xf32>
    %247 = vector.shape_cast %246 : vector<1x32xf32> to vector<1x1x32xf32>
    %248 = vector.broadcast %247 : vector<1x1x32xf32> to vector<2x8x32xf32>
    %249 = arith.addf %245, %248 : vector<2x8x32xf32>
    %c0_82 = arith.constant 0 : index
    %c0_83 = arith.constant 0 : index
    %250 = vector.load %arg18[%c0_82, %c0_83] : memref<1x2xf32, #tpu.memory_space<vmem>>, vector<1x2xf32>
    %251 = vector.extract_strided_slice %249 {offsets = [0, 0, 0], sizes = [1, 8, 32], strides = [1, 1, 1]} : vector<2x8x32xf32> to vector<1x8x32xf32>
    %252 = vector.shape_cast %251 : vector<1x8x32xf32> to vector<8x32xf32>
    %c0_84 = arith.constant 0 : index
    %c0_85 = arith.constant 0 : index
    %c0_86 = arith.constant 0 : index
    %253 = vector.load %arg17[%c0_84, %c0_85, %c0_86] : memref<2x32x2xf32, #tpu.memory_space<vmem>>, vector<1x32x2xf32>
    %254 = vector.shape_cast %253 : vector<1x32x2xf32> to vector<32x2xf32>
    %cst_87 = arith.constant dense<0.000000e+00> : vector<8x2xf32>
    %255 = tpu.matmul %252, %254, %cst_87 {dimension_numbers = #tpu.dot_dimension_numbers<[1], [0], [0], [1], [0, 0, 1, 1], [], []>} : vector<8x32xf32>, vector<32x2xf32>, vector<8x2xf32> -> vector<8x2xf32>
    %256 = vector.broadcast %250 : vector<1x2xf32> to vector<8x2xf32>
    %257 = arith.addf %256, %255 : vector<8x2xf32>
    %258 = vector.extract_strided_slice %249 {offsets = [1, 0, 0], sizes = [1, 8, 32], strides = [1, 1, 1]} : vector<2x8x32xf32> to vector<1x8x32xf32>
    %259 = vector.shape_cast %258 : vector<1x8x32xf32> to vector<8x32xf32>
    %c1 = arith.constant 1 : index
    %c0_88 = arith.constant 0 : index
    %c0_89 = arith.constant 0 : index
    %260 = vector.load %arg17[%c1, %c0_88, %c0_89] : memref<2x32x2xf32, #tpu.memory_space<vmem>>, vector<1x32x2xf32>
    %261 = vector.shape_cast %260 : vector<1x32x2xf32> to vector<32x2xf32>
    %cst_90 = arith.constant dense<0.000000e+00> : vector<8x2xf32>
    %262 = tpu.matmul %259, %261, %cst_90 {dimension_numbers = #tpu.dot_dimension_numbers<[1], [0], [0], [1], [0, 0, 1, 1], [], []>} : vector<8x32xf32>, vector<32x2xf32>, vector<8x2xf32> -> vector<8x2xf32>
    %263 = arith.addf %257, %262 : vector<8x2xf32>
    %264 = vector.shape_cast %263 : vector<8x2xf32> to vector<1x8x2xf32>
    %c0_91 = arith.constant 0 : index
    %c0_92 = arith.constant 0 : index
    %c0_93 = arith.constant 0 : index
    %265 = vector.load %arg19[%c0_91, %c0_92, %c0_93] : memref<1x8x2xf32, #tpu.memory_space<vmem>>, vector<1x8x2xf32>
    tpu.vector_store %arg19[%c0_91, %c0_92, %c0_93], %264 {strides = array<i32>} : memref<1x8x2xf32, #tpu.memory_space<vmem>>, vector<1x8x2xf32>,
    return
  }
  func.func @transform_0(%arg0: i32) -> (i32, i32, i32) {
    %c0_i32 = arith.constant 0 : i32
    %c0_i32_0 = arith.constant 0 : i32
    %c0_i32_1 = arith.constant 0 : i32
    return %arg0, %c0_i32, %c0_i32_0 : i32, i32, i32
  }
  func.func @transform_1(%arg0: i32) -> (i32, i32) {
    %c0_i32 = arith.constant 0 : i32
    %c0_i32_0 = arith.constant 0 : i32
    %c0_i32_1 = arith.constant 0 : i32
    return %c0_i32, %c0_i32_0 : i32, i32
  }
  func.func @transform_2(%arg0: i32) -> (i32, i32) {
    %c0_i32 = arith.constant 0 : i32
    %c0_i32_0 = arith.constant 0 : i32
    %c0_i32_1 = arith.constant 0 : i32
    return %c0_i32, %c0_i32_0 : i32, i32
  }
  func.func @transform_3(%arg0: i32) -> (i32, i32) {
    %c0_i32 = arith.constant 0 : i32
    %c0_i32_0 = arith.constant 0 : i32
    %c0_i32_1 = arith.constant 0 : i32
    return %c0_i32, %c0_i32_0 : i32, i32
  }
  func.func @transform_4(%arg0: i32) -> (i32, i32) {
    %c0_i32 = arith.constant 0 : i32
    %c0_i32_0 = arith.constant 0 : i32
    %c0_i32_1 = arith.constant 0 : i32
    return %c0_i32, %c0_i32_0 : i32, i32
  }
  func.func @transform_5(%arg0: i32) -> (i32, i32) {
    %c0_i32 = arith.constant 0 : i32
    %c0_i32_0 = arith.constant 0 : i32
    %c0_i32_1 = arith.constant 0 : i32
    return %c0_i32, %c0_i32_0 : i32, i32
  }
  func.func @transform_6(%arg0: i32) -> (i32, i32) {
    %c0_i32 = arith.constant 0 : i32
    %c0_i32_0 = arith.constant 0 : i32
    %c0_i32_1 = arith.constant 0 : i32
    return %c0_i32, %c0_i32_0 : i32, i32
  }
  func.func @transform_7(%arg0: i32) -> (i32, i32) {
    %c0_i32 = arith.constant 0 : i32
    %c0_i32_0 = arith.constant 0 : i32
    %c0_i32_1 = arith.constant 0 : i32
    return %c0_i32, %c0_i32_0 : i32, i32
  }
  func.func @transform_8(%arg0: i32) -> (i32, i32) {
    %c0_i32 = arith.constant 0 : i32
    %c0_i32_0 = arith.constant 0 : i32
    %c0_i32_1 = arith.constant 0 : i32
    return %c0_i32, %c0_i32_0 : i32, i32
  }
  func.func @transform_9(%arg0: i32) -> (i32, i32, i32) {
    %c0_i32 = arith.constant 0 : i32
    %c0_i32_0 = arith.constant 0 : i32
    %c0_i32_1 = arith.constant 0 : i32
    return %arg0, %c0_i32, %c0_i32_0 : i32, i32, i32
  }
  func.func @transform_10(%arg0: i32) -> (i32, i32) {
    %c0_i32 = arith.constant 0 : i32
    %c0_i32_0 = arith.constant 0 : i32
    %c0_i32_1 = arith.constant 0 : i32
    return %c0_i32, %c0_i32_0 : i32, i32
  }
  func.func @transform_11(%arg0: i32) -> (i32, i32) {
    %c0_i32 = arith.constant 0 : i32
    %c0_i32_0 = arith.constant 0 : i32
    %c0_i32_1 = arith.constant 0 : i32
    return %c0_i32, %c0_i32_0 : i32, i32
  }
  func.func @transform_12(%arg0: i32) -> (i32, i32) {
    %c0_i32 = arith.constant 0 : i32
    %c0_i32_0 = arith.constant 0 : i32
    %c0_i32_1 = arith.constant 0 : i32
    return %c0_i32, %c0_i32_0 : i32, i32
  }
  func.func @transform_13(%arg0: i32) -> (i32, i32) {
    %c0_i32 = arith.constant 0 : i32
    %c0_i32_0 = arith.constant 0 : i32
    %c0_i32_1 = arith.constant 0 : i32
    return %c0_i32, %c0_i32_0 : i32, i32
  }
  func.func @transform_14(%arg0: i32) -> (i32, i32) {
    %c0_i32 = arith.constant 0 : i32
    %c0_i32_0 = arith.constant 0 : i32
    %c0_i32_1 = arith.constant 0 : i32
    return %c0_i32, %c0_i32_0 : i32, i32
  }
  func.func @transform_15(%arg0: i32) -> (i32, i32) {
    %c0_i32 = arith.constant 0 : i32
    %c0_i32_0 = arith.constant 0 : i32
    %c0_i32_1 = arith.constant 0 : i32
    return %c0_i32, %c0_i32_0 : i32, i32
  }
  func.func @transform_16(%arg0: i32) -> (i32, i32, i32) {
    %c0_i32 = arith.constant 0 : i32
    %c0_i32_0 = arith.constant 0 : i32
    %c0_i32_1 = arith.constant 0 : i32
    %c0_i32_2 = arith.constant 0 : i32
    return %c0_i32, %c0_i32_0, %c0_i32_1 : i32, i32, i32
  }
  func.func @transform_17(%arg0: i32) -> (i32, i32) {
    %c0_i32 = arith.constant 0 : i32
    %c0_i32_0 = arith.constant 0 : i32
    %c0_i32_1 = arith.constant 0 : i32
    return %c0_i32, %c0_i32_0 : i32, i32
  }
  func.func @transform_18(%arg0: i32) -> (i32, i32, i32) {
    %c0_i32 = arith.constant 0 : i32
    %c0_i32_0 = arith.constant 0 : i32
    %c0_i32_1 = arith.constant 0 : i32
    return %arg0, %c0_i32, %c0_i32_0 : i32, i32, i32
  }
}

</mosaic_0001>

<bundles_post_ra>
// kernel: tpu_custom_call.1
= control target key start
LH: loop header
LB: loop body
LE: loop exit
PB: predicated region body
PF: predicated region fallthrough
CT: control target
= control target key end

     0   :  { %s2228_s27 = smov 0   ;;  %s2505_s0 = inlined_call_operand.vmem [shape: f32[2,64,4], index: 0, kind: input, shape index: {}]   ;;  %s2506_s1 = inlined_call_operand.vmem [shape: f32[8,8], index: 1, kind: input, shape index: {}]   ;;  %s2507_s2 = inlined_call_operand.vmem [shape: f32[4,16], index: 2, kind: input, shape index: {}]   ;;  %s2508_s3 = inlined_call_operand.vmem [shape: f32[1,16], index: 3, kind: input, shape index: {}]   ;;  %s2509_s4 = inlined_call_operand.vmem [shape: f32[16,32], index: 4, kind: input, shape index: {}]   ;;  %s2510_s5 = inlined_call_operand.vmem [shape: f32[1,32], index: 5, kind: input, shape index: {}]   ;;  %s2511_s6 = inlined_call_operand.vmem [shape: f32[32,128], index: 6, kind: input, shape index: {}]   ;;  %s2512_s7 = inlined_call_operand.vmem [shape: f32[1,128], index: 7, kind: input, shape index: {}]   ;;  %s2513_s8 = inlined_call_operand.vmem [shape: f32[32,128], index: 8, kind: input, shape index: {}]   ;;  %s2514_s9 = inlined_call_operand.vmem [shape: f32[2,16,4], index: 9, kind: input, shape index: {}]   ;;  %s2515_s10 = inlined_call_operand.vmem [shape: f32[4,32], index: 10, kind: input, shape index: {}]   ;;  %s2516_s11 = inlined_call_operand.vmem [shape: f32[1,32], index: 11, kind: input, shape index: {}]   ;;  %s2517_s12 = inlined_call_operand.vmem [shape: f32[2,32], index: 12, kind: input, shape index: {}]   ;;  %s2518_s13 = inlined_call_operand.vmem [shape: f32[2,32], index: 13, kind: input, shape index: {}]   ;;  %s2519_s14 = inlined_call_operand.vmem [shape: f32[1,32], index: 14, kind: input, shape index: {}]   ;;  %s2520_s15 = inlined_call_operand.vmem [shape: f32[1,32], index: 15, kind: input, shape index: {}]   ;;  %s2521_s16 = inlined_call_operand.vmem [shape: f32[2,32,2], index: 16, kind: input, shape index: {}]   ;;  %s2522_s17 = inlined_call_operand.vmem [shape: f32[1,2], index: 17, kind: input, shape index: {}]   ;;  %s2523_s18 = inlined_call_operand.vmem [shape: f32[2,8,2], index: 18, kind: output, shape index: {}]  }
   0x1   :  { %2524 = sst [smem:[#allocation3_spill]] %s2505_s0 }
   0x2   :  { %2525 = sst [smem:[#allocation4_spill]] %s2506_s1 }
   0x3   :  { %2526 = sst [smem:[#allocation5_spill]] %s2507_s2 }
   0x4 LB: > { %s1953_s28 = sadd.s32 4294967295, %s2127_s27   ;;  %p1957_p0 = scmp.ge.s32.totalorder %s2127_s27, 1  ;;  %s2127_s27 = sphi %s2228_s27, %s28_s27  }
   0x5   : > { %p522_p1 = scmp.lt.s32.totalorder %s2127_s27, 3 }
   0x7   : > { %p523_p2 = pnand %p1957_p0, %p522_p1 }
   0x8   : > { %s2527_s0 = sld [smem:[#allocation5_spill]] (!%p523_p2)  ;;  %p580_p3 = scmp.lt.s32.totalorder (!%p523_p2), %s1953_s28, 1 }
   0x9   : > { %526 = sbr.rel (%p523_p2) target bundleno = 5603 (0x15e3), region = 92  ;;  %s2528_s21 = sld [smem:[#allocation3_spill]] (!%p523_p2) }
   0xa   : > { %s2529_s24 = sld [smem:[#allocation4_spill]] (!%p523_p2)  ;;  %s2130_s25 = smov (!%p523_p2), 32  }
   0xb   : > { %s2131_s26 = smov (!%p523_p2), 64  }
   0xe   : > { %v603_v0 = vld [vmem:[%s2527_s0] sm:$0xf]  ;;  %vm629_vm0 = vcmask 1043456   ;;  %s2531_s28 = smov (!%p580_p3, %s1953_s28), 1  ;;  %vm604_vm1 = vcmask 31744   ;;  %vm678_vm2 = vcmask 64512  }
   0xf   : > { %1963 = vmatpush.msk.msra.mxu0 %vm629_vm0, %v603_v0  ;;  %s2030_s19 = sshll.u32 %s2531_s28, 6  ;;  %v851_v18 = vld [vmem:[%s2509_s4 + $0x8] sm:$0xff]  ;;  %v850_v19 = vld [vmem:[%s2509_s4] sm:$0xff]  ;;  %vm852_vm3 = vcmask 130048   ;;  %v2303_v49 = vld [vmem:[%s2513_s8 + $0x18] sm:$0xff]  ;;  %v2129_v59 = vmov 0.0  }
  0x10   : > { %s584_s22 = scalar_lea.vmem %s2528_s21, %s2030_s19  ;;  %v2257_v9 = vld [vmem:[%s2529_s24] sm:$0xff]  ;;  %v2310_v50 = vld [vmem:[%s2513_s8 + $0x10] sm:$0xff]  ;;  %v2317_v51 = vld [vmem:[%s2513_s8 + $0x8] sm:$0xff]  ;;  %vm1090_vm4 = vcmask 261120   ;;  %s2031_s1 = sshll.u32 %s2531_s28, 4 }
  0x11   : > { %v595_v1 = vld [vmem:[%s584_s22] sm:$0xff]  ;;  %v596_v2 = vld [vmem:[%s584_s22 + $0x8] sm:$0xff]  ;;  %v597_v3 = vld [vmem:[%s584_s22 + $0x10] sm:$0xff]  ;;  %1249 = vmatpush.msrb.mxu0 %v2303_v49  ;;  %s1962_s2 = sshll.u32 %s2531_s28, 3 }
  0x12   : > { %1964 = vmatmul.msk.f32.vlgmr.msra.gmra.mxu0 %vm604_vm1, %v595_v1  ;;  %v598_v4 = vld [vmem:[%s584_s22 + $0x18] sm:$0xff]  ;;  %v599_v5 = vld [vmem:[%s584_s22 + $0x20] sm:$0xff]  ;;  %v600_v6 = vld [vmem:[%s584_s22 + $0x28] sm:$0xff]  ;;  %s593_s29 = scalar_lea.vmem %s2523_s18, %s1962_s2 }
  0x13   : > { %v601_v7 = vld [vmem:[%s584_s22 + $0x30] sm:$0xff]  ;;  %v602_v8 = vld [vmem:[%s584_s22 + $0x38] sm:$0xff]  ;;  %v2044_v20 = vld [vmem:[%s2508_s3] ss:$0 sm:$0xff]  ;;  %1250 = vmatpush.msrb.mxu0 %v2310_v50  ;;  %s589_s22 = scalar_lea.vmem %s2514_s9, %s2031_s1 }
  0x14   : > { %v2324_v53 = vld [vmem:[%s2513_s8] sm:$0xff]  ;;  %v1085_v56 = vld [vmem:[%s2511_s6 + $0x18] sm:$0xff]  ;;  %v1084_v57 = vld [vmem:[%s2511_s6 + $0x10] sm:$0xff] }
  0x15   : > { %1251 = vmatpush.msrb.mxu0 %v2317_v51  ;;  %v1083_v60 = vld [vmem:[%s2511_s6 + $0x8] sm:$0xff]  ;;  %v1082_v61 = vld [vmem:[%s2511_s6] sm:$0xff] }
  0x16   : > { %v2045_v62 = vld [vmem:[%s2510_s5] ss:$0 sm:$0xff] }
  0x17   : > { %1252 = vmatpush.msrb.mxu0 %v2324_v53 }
  0x19   : > { %1379 = vmatpush.msra.mxu0 %v2303_v49 }
  0x1a   : > { %1965 = vmatmul.msk.f32.gmra.mxu0 %vm604_vm1, %v596_v2 }
  0x1b   : > { %1380 = vmatpush.msra.mxu0 %v2310_v50 }
  0x1d   : > { %1381 = vmatpush.msra.mxu0 %v2317_v51 }
  0x1f   : > { %1382 = vmatpush.msra.mxu0 %v2324_v53 }
  0x22   : > { %1966 = vmatmul.msk.f32.gmra.mxu0 %vm604_vm1, %v597_v3 }
  0x2a   : > { %1967 = vmatmul.msk.f32.gmra.mxu0 %vm604_vm1, %v598_v4 }
  0x32   : > { %1968 = vmatmul.msk.f32.gmra.mxu0 %vm604_vm1, %v599_v5 }
  0x3a   : > { %1969 = vmatmul.msk.f32.gmra.mxu0 %vm604_vm1, %v600_v6 }
  0x42   : > { %1970 = vmatmul.msk.f32.gmra.mxu0 %vm604_vm1, %v601_v7 }
  0x4a   : > { %1971 = vmatmul.msk.f32.gmra.mxu0 %vm604_vm1, %v602_v8 }
  0x8f   : > { %v650_v10 = vpop.f32.mrf.mxu0 }
  0x90   : > { %697 = vmatpush.msra.mxu2 %v650_v10 }
  0x91   : > { %1972 = vmatmul.msk.f32.vlgmr.msra.gmra.mxu2 %vm678_vm2, %v2257_v9 }
  0x97   : > { %v653_v11 = vpop.f32.mrf.mxu0 }
  0x98   : > { %717 = vmatpush.msrb.mxu2 %v653_v11 }
  0x99   : > { %1973 = vmatmul.msk.f32.vlgmr.msrb.gmra.mxu2 %vm678_vm2, %v2257_v9 }
  0x9f   : > { %v656_v12 = vpop.f32.mrf.mxu0 }
  0xa0   : > { %737 = vmatpush.msra.mxu3 %v656_v12 }
  0xa1   : > { %1974 = vmatmul.msk.f32.vlgmr.msra.gmra.mxu3 %vm678_vm2, %v2257_v9 }
  0xa7   : > { %v659_v13 = vpop.f32.mrf.mxu0 }
  0xa8   : > { %757 = vmatpush.msrb.mxu3 %v659_v13 }
  0xa9   : > { %1975 = vmatmul.msk.f32.vlgmr.msrb.gmra.mxu3 %vm678_vm2, %v2257_v9 }
  0xaf   : > { %v662_v14 = vpop.f32.mrf.mxu0 }
  0xb0   : > { %777 = vmatpush.msra.mxu2 %v662_v14 }
  0xb1   : > { %1976 = vmatmul.msk.f32.vlgmr.msra.gmra.mxu2 %vm678_vm2, %v2257_v9 }
  0xb7   : > { %v665_v15 = vpop.f32.mrf.mxu0 }
  0xb8   : > { %797 = vmatpush.msra.mxu3 %v665_v15  ;;  %v2378_v15 = vld [vmem:[%s2512_s7] ss:$0 sm:$0xff] }
  0xb9   : > { %1977 = vmatmul.msk.f32.vlgmr.msra.gmra.mxu3 %vm678_vm2, %v2257_v9 }
  0xba   : > { %891 = vmatpush.msrb.mxu3 %v851_v18 }
  0xbc   : > { %892 = vmatpush.msrb.mxu3 %v850_v19 }
  0xbe   : > { %1639 = vmatpush.msra.mxu3 %v2303_v49 }
  0xbf   : > { %v668_v16 = vpop.f32.mrf.mxu0 }
  0xc0   : > { %817 = vmatpush.msra.mxu1 %v668_v16  ;;  %1640 = vmatpush.msra.mxu3 %v2310_v50 }
  0xc1   : > { %1978 = vmatmul.msk.f32.vlgmr.msra.gmra.mxu1 %vm678_vm2, %v2257_v9 }
  0xc2   : > { %1641 = vmatpush.msra.mxu3 %v2317_v51 }
  0xc4   : > { %1642 = vmatpush.msra.mxu3 %v2324_v53 }
  0xc7   : > { %v671_v17 = vpop.f32.mrf.mxu0 }
  0xc8   : > { %837 = vmatpush.msrb.mxu2 %v671_v17 }
  0xc9   : > { %1979 = vmatmul.msk.f32.vlgmr.msrb.gmra.mxu2 %vm678_vm2, %v2257_v9 }
 0x114   : > { %v699_v21 = vpop.f32.mrf.mxu2 }
 0x115   : > { %v700_v22 = vadd.f32 %v2044_v20, %v699_v21 }
 0x117   : > { %v842_v23 = vmax.f32 %v700_v22, 0.0 }
 0x119   : > { %1980 = vmatmul.msk.f32.vlgmr.msrb.gmra.mxu3 %vm852_vm3, %v842_v23 }
 0x11c   : > { %v719_v24 = vpop.f32.mrf.mxu2 }
 0x11d   : > { %v720_v25 = vadd.f32 %v2044_v20, %v719_v24 }
 0x11f   : > { %v843_v26 = vmax.f32 %v720_v25, 0.0 }
 0x121   : > { %1981 = vmatmul.msk.f32.gmra.mxu3 %vm852_vm3, %v843_v26 }
 0x124   : > { %v739_v27 = vpop.f32.mrf.mxu3 }
 0x125   : > { %v740_v28 = vadd.f32 %v2044_v20, %v739_v27 }
 0x127   : > { %v844_v29 = vmax.f32 %v740_v28, 0.0 }
 0x129   : > { %1982 = vmatmul.msk.f32.gmra.mxu3 %vm852_vm3, %v844_v29 }
 0x12c   : > { %v759_v30 = vpop.f32.mrf.mxu3 }
 0x12d   : > { %v760_v31 = vadd.f32 %v2044_v20, %v759_v30 }
 0x12f   : > { %v845_v32 = vmax.f32 %v760_v31, 0.0 }
 0x131   : > { %1983 = vmatmul.msk.f32.gmra.mxu3 %vm852_vm3, %v845_v32 }
 0x134   : > { %v779_v33 = vpop.f32.mrf.mxu2 }
 0x135   : > { %v780_v34 = vadd.f32 %v2044_v20, %v779_v33 }
 0x137   : > { %v846_v35 = vmax.f32 %v780_v34, 0.0 }
 0x139   : > { %1984 = vmatmul.msk.f32.gmra.mxu3 %vm852_vm3, %v846_v35 }
 0x13c   : > { %v799_v36 = vpop.f32.mrf.mxu3 }
 0x13d   : > { %v800_v37 = vadd.f32 %v2044_v20, %v799_v36 }
 0x13e   : > { %v819_v38 = vpop.f32.mrf.mxu1 }
 0x13f   : > { %v847_v39 = vmax.f32 %v800_v37, 0.0  ;;  %v820_v40 = vadd.f32 %v2044_v20, %v819_v38 }
 0x141   : > { %1985 = vmatmul.msk.f32.gmra.mxu3 %vm852_vm3, %v847_v39  ;;  %v848_v41 = vmax.f32 %v820_v40, 0.0 }
 0x149   : > { %1986 = vmatmul.msk.f32.gmra.mxu3 %vm852_vm3, %v848_v41 }
 0x14c   : > { %v839_v42 = vpop.f32.mrf.mxu2 }
 0x14d   : > { %v840_v43 = vadd.f32 %v2044_v20, %v839_v42 }
 0x14f   : > { %v849_v44 = vmax.f32 %v840_v43, 0.0 }
 0x151   : > { %1987 = vmatmul.msk.f32.gmra.mxu3 %vm852_vm3, %v849_v44 }
 0x19c   : > { %v894_v45 = vpop.f32.mrf.mxu3 }
 0x19d   : > { %937 = vmatpush.msrb.mxu1 %v894_v45 }
 0x19e   : > { %1988 = vmatmul.msk.f32.vlgmr.msrb.gmra.mxu1 %vm678_vm2, %v2257_v9 }
 0x1a4   : > { %v897_v46 = vpop.f32.mrf.mxu3 }
 0x1a5   : > { %957 = vmatpush.msra.mxu2 %v897_v46 }
 0x1a6   : > { %1989 = vmatmul.msk.f32.vlgmr.msra.gmra.mxu2 %vm678_vm2, %v2257_v9 }
 0x1ac   : > { %v900_v47 = vpop.f32.mrf.mxu3 }
 0x1ad   : > { %977 = vmatpush.msra.mxu1 %v900_v47 }
 0x1ae   : > { %1990 = vmatmul.msk.f32.vlgmr.msra.gmra.mxu1 %vm678_vm2, %v2257_v9 }
 0x1b4   : > { %v903_v48 = vpop.f32.mrf.mxu3 }
 0x1b5   : > { %997 = vmatpush.msrb.mxu2 %v903_v48 }
 0x1b6   : > { %1991 = vmatmul.msk.f32.vlgmr.msrb.gmra.mxu2 %vm678_vm2, %v2257_v9 }
 0x1bc   : > { %v906_v52 = vpop.f32.mrf.mxu3 }
 0x1bd   : > { %1017 = vmatpush.msrb.mxu1 %v906_v52 }
 0x1be   : > { %1992 = vmatmul.msk.f32.vlgmr.msrb.gmra.mxu1 %vm678_vm2, %v2257_v9 }
 0x1c4   : > { %v909_v54 = vpop.f32.mrf.mxu3 }
 0x1c5   : > { %1037 = vmatpush.msra.mxu2 %v909_v54 }
 0x1c6   : > { %1993 = vmatmul.msk.f32.vlgmr.msra.gmra.mxu2 %vm678_vm2, %v2257_v9 }
 0x1cc   : > { %v912_v55 = vpop.f32.mrf.mxu3 }
 0x1cd   : > { %1057 = vmatpush.msra.mxu1 %v912_v55 }
 0x1ce   : > { %1994 = vmatmul.msk.f32.vlgmr.msra.gmra.mxu1 %vm678_vm2, %v2257_v9 }
 0x1cf   : > { %1127 = vmatpush.msrb.mxu1 %v1085_v56 }
 0x1d1   : > { %1128 = vmatpush.msrb.mxu1 %v1084_v57 }
 0x1d3   : > { %1129 = vmatpush.msrb.mxu1 %v1083_v60 }
 0x1d4   : > { %v915_v58 = vpop.f32.mrf.mxu3 }
 0x1d5   : > { %1077 = vmatpush.msrb.mxu2 %v915_v58  ;;  %1130 = vmatpush.msrb.mxu1 %v1082_v61 }
 0x1d6   : > { %1995 = vmatmul.msk.f32.vlgmr.msrb.gmra.mxu2 %vm678_vm2, %v2257_v9 }
 0x1d7   : > { %1184 = vmatpush.msra.mxu2 %v2303_v49 }
 0x1d9   : > { %1185 = vmatpush.msra.mxu2 %v2310_v50 }
 0x1db   : > { %1186 = vmatpush.msra.mxu2 %v2317_v51 }
 0x1dd   : > { %1187 = vmatpush.msra.mxu2 %v2324_v53 }
 0x1de   : > { %1188 = vmatmul.f32.vlgmr.msra.gmra.mxu2 %v2129_v59 }
 0x1df   : > { %1314 = vmatpush.msrb.mxu2 %v2303_v49 }
 0x1e1   : > { %1315 = vmatpush.msrb.mxu2 %v2310_v50 }
 0x1e3   : > { %1316 = vmatpush.msrb.mxu2 %v2317_v51 }
 0x1e5   : > { %1317 = vmatpush.msrb.mxu2 %v2324_v53 }
 0x1e7   : > { %1444 = vmatpush.msra.mxu2 %v2303_v49 }
 0x1e9   : > { %1445 = vmatpush.msra.mxu2 %v2310_v50 }
 0x1eb   : > { %1446 = vmatpush.msra.mxu2 %v2317_v51 }
 0x1ed   : > { %1447 = vmatpush.msra.mxu2 %v2324_v53 }
 0x21b   : > { %v939_v63 = vpop.f32.mrf.mxu1 }
 0x21c   : > { %v940_v0 = vadd.f32 %v2045_v62, %v939_v63 }
 0x21e   : > { %1996 = vmatmul.msk.f32.vlgmr.msrb.gmra.mxu1 %vm1090_vm4, %v940_v0 }
 0x229   : > { %v959_v1 = vpop.f32.mrf.mxu2 }
 0x22a   : > { %v960_v2 = vadd.f32 %v2045_v62, %v959_v1 }
 0x22b   : > { %v979_v3 = vpop.f32.mrf.mxu1 }
 0x22c   : > { %1997 = vmatmul.msk.f32.gmra.mxu1 %vm1090_vm4, %v960_v2  ;;  %v980_v4 = vadd.f32 %v2045_v62, %v979_v3 }
 0x234   : > { %1998 = vmatmul.msk.f32.gmra.mxu1 %vm1090_vm4, %v980_v4 }
 0x239   : > { %v999_v5 = vpop.f32.mrf.mxu2 }
 0x23a   : > { %v1000_v6 = vadd.f32 %v2045_v62, %v999_v5 }
 0x23b   : > { %v1019_v7 = vpop.f32.mrf.mxu1 }
 0x23c   : > { %1999 = vmatmul.msk.f32.gmra.mxu1 %vm1090_vm4, %v1000_v6  ;;  %v1020_v8 = vadd.f32 %v2045_v62, %v1019_v7 }
 0x244   : > { %2000 = vmatmul.msk.f32.gmra.mxu1 %vm1090_vm4, %v1020_v8 }
 0x249   : > { %v1039_v9 = vpop.f32.mrf.mxu2 }
 0x24a   : > { %v1040_v10 = vadd.f32 %v2045_v62, %v1039_v9 }
 0x24b   : > { %v1059_v11 = vpop.f32.mrf.mxu1 }
 0x24c   : > { %2001 = vmatmul.msk.f32.gmra.mxu1 %vm1090_vm4, %v1040_v10  ;;  %v1060_v12 = vadd.f32 %v2045_v62, %v1059_v11 }
 0x254   : > { %2002 = vmatmul.msk.f32.gmra.mxu1 %vm1090_vm4, %v1060_v12 }
 0x259   : > { %v1079_v13 = vpop.f32.mrf.mxu2 }
 0x25a   : > { %v1080_v14 = vadd.f32 %v2045_v62, %v1079_v13 }
 0x25c   : > { %2003 = vmatmul.msk.f32.gmra.mxu1 %vm1090_vm4, %v1080_v14 }
 0x261   : > { %v1189_v17 = vpop.f32.mrf.mxu2 }
 0x29b   : > { %v1132_v16 = vpop.f32.mrf.mxu1 }
 0x29c   : > { %v1133_v18 = vadd.f32 %v2378_v15, %v1132_v16 }
 0x29e   : > { %v1192_v19 = vadd.f32 %v1189_v17, %v1133_v18 }
 0x2a0   : > { %2051 = vtanh.f32 %v1192_v19  ;;  %v2004_v21 = vmul.f32 -1.442695, %v1192_v19 }
 0x2a2   : > { %2053 = vpow2.f32 %v2004_v21 }
 0x2a6   : > { %v2052_v20 = vpop.eup %2051 }
 0x2a7   : > { %1215 = vrot.lane.b32.xlu0 %v2052_v20, %s2130_s25 }
 0x2a8   : > { %v2054_v22 = vpop.eup %2053 }
 0x2a9   : > { %v1196_v23 = vadd.f32 1.0, %v2054_v22  ;;  %v1135_v43 = vpop.f32.mrf.mxu1 }
 0x2aa   : > { %v1136_v44 = vadd.f32 %v2378_v15, %v1135_v43 }
 0x2ab   : > { %2055 = vrcp.f32 %v1196_v23  ;;  %v1208_v29 = vand.u32 2147483648, %v1196_v23  ;;  %vm1202_vm6 = vweird.f32 %v1196_v23  ;;  %v1206_v30 = vand.u32 2147483647, %v1196_v23 }
 0x2ad   : > { %v1209_v32 = vor.u32 1.1754944e-38, %v1208_v29  ;;  %vm1207_vm8 = vcmp.eq.f32.partialorder %v1206_v30, 8.507059e+37 }
 0x2b1   : > { %v2056_v24 = vpop.eup %2055  ;;  %v1138_v10 = vpop.f32.mrf.mxu1 }
 0x2b2   : > { %v1198_v25 = vmul.f32 %v2056_v24, %v1196_v23  ;;  %vm1203_vm5 = vweird.f32 %v2056_v24  ;;  %v1139_v11 = vadd.f32 %v2378_v15, %v1138_v10 }
 0x2b3   : > { %vm1204_vm7 = vmor %vm1202_vm6, %vm1203_vm5 }
 0x2b4   : > { %v1199_v26 = vsub.f32 1.0, %v1198_v25 }
 0x2b6   : > { %v1200_v27 = vmul.f32 %v2056_v24, %v1199_v26 }
 0x2b8   : > { %v1201_v28 = vadd.f32 %v2056_v24, %v1200_v27 }
 0x2ba   : > { %v1205_v31 = vsel %vm1204_vm7, %v2056_v24, %v1201_v28 }
 0x2bb   : > { %v1210_v34 = vsel %vm1207_vm8, %v1209_v32, %v1205_v31 }
 0x2bc   : > { %v1213_v36 = vmul.f32 0.0, %v1210_v34 }
 0x319   : > { %v1216_v33 = vpop.permute.xlu0 %1215 }
 0x31a   : > { %v1218_v35 = vmul.f32 %v1216_v33, %v1210_v34 }
 0x31c   : > { %1220 = vrot.lane.b32.xlu0 %v1218_v35, %s2130_s25 }
 0x38e   : > { %v1221_v37 = vpop.permute.xlu0 %1220 }
 0x38f   : > { %v1223_v38 = vadd.f32 %v1221_v37, %v1213_v36 }
 0x391   : > { %2057 = vtanh.f32 %v1223_v38 }
 0x397   : > { %v2058_v39 = vpop.eup %2057 }
 0x398   : > { %1226 = vrot.lane.b32.xlu1 %v2058_v39, %s2130_s25 }
 0x40a   : > { %v1227_v40 = vpop.permute.xlu1 %1226 }
 0x40b   : > { %v1229_v41 = vmul.f32 %v1227_v40, %v1210_v34  ;;  %v1141_v34 = vpop.f32.mrf.mxu1 }
 0x40c   : > { %v1142_v35 = vadd.f32 %v2378_v15, %v1141_v34 }
 0x40d   : > { %1233 = vrot.lane.b32.xlu1 %v1229_v41, %s2131_s26 }
 0x47f   : > { %v1234_v42 = vpop.permute.xlu1 %1233 }
 0x480   : > { %2005 = vmatmul.msk.f32.vlgmr.msrb.gmra.mxu0 %vm1090_vm4, %v1234_v42 }
 0x481   : > { %1509 = vmatpush.msrb.mxu0 %v2303_v49 }
 0x483   : > { %1510 = vmatpush.msrb.mxu0 %v2310_v50 }
 0x485   : > { %1511 = vmatpush.msrb.mxu0 %v2317_v51 }
 0x487   : > { %1512 = vmatpush.msrb.mxu0 %v2324_v53 }
 0x4fd   : > { %v1254_v45 = vpop.f32.mrf.mxu0 }
 0x4fe   : > { %v1257_v46 = vadd.f32 %v1254_v45, %v1136_v44 }
 0x500   : > { %2059 = vtanh.f32 %v1257_v46  ;;  %v2006_v48 = vmul.f32 -1.442695, %v1257_v46 }
 0x502   : > { %2061 = vpow2.f32 %v2006_v48 }
 0x506   : > { %v2060_v47 = vpop.eup %2059 }
 0x507   : > { %1280 = vrot.lane.b32.xlu2 %v2060_v47, %s2130_s25 }
 0x508   : > { %v2062_v52 = vpop.eup %2061 }
 0x509   : > { %v1261_v54 = vadd.f32 1.0, %v2062_v52 }
 0x50b   : > { %2063 = vrcp.f32 %v1261_v54  ;;  %v1273_v60 = vand.u32 2147483648, %v1261_v54  ;;  %vm1267_vm10 = vweird.f32 %v1261_v54  ;;  %v1271_v61 = vand.u32 2147483647, %v1261_v54 }
 0x50d   : > { %v1274_v63 = vor.u32 1.1754944e-38, %v1273_v60  ;;  %vm1272_vm12 = vcmp.eq.f32.partialorder %v1271_v61, 8.507059e+37 }
 0x511   : > { %v2064_v55 = vpop.eup %2063 }
 0x512   : > { %v1263_v56 = vmul.f32 %v2064_v55, %v1261_v54  ;;  %vm1268_vm9 = vweird.f32 %v2064_v55 }
 0x513   : > { %vm1269_vm11 = vmor %vm1267_vm10, %vm1268_vm9 }
 0x514   : > { %v1264_v57 = vsub.f32 1.0, %v1263_v56 }
 0x516   : > { %v1265_v58 = vmul.f32 %v2064_v55, %v1264_v57 }
 0x518   : > { %v1266_v59 = vadd.f32 %v2064_v55, %v1265_v58 }
 0x51a   : > { %v1270_v62 = vsel %vm1269_vm11, %v2064_v55, %v1266_v59 }
 0x51b   : > { %v1275_v1 = vsel %vm1272_vm12, %v1274_v63, %v1270_v62 }
 0x51c   : > { %v1278_v3 = vmul.f32 %v1275_v1, %v1223_v38 }
 0x561   : > { %v1281_v0 = vpop.permute.xlu2 %1280 }
 0x562   : > { %v1283_v2 = vmul.f32 %v1281_v0, %v1275_v1 }
 0x564   : > { %1285 = vrot.lane.b32.xlu2 %v1283_v2, %s2130_s25 }
 0x5be   : > { %v1286_v4 = vpop.permute.xlu2 %1285 }
 0x5bf   : > { %v1288_v5 = vadd.f32 %v1286_v4, %v1278_v3 }
 0x5c1   : > { %2065 = vtanh.f32 %v1288_v5 }
 0x5c7   : > { %v2066_v6 = vpop.eup %2065 }
 0x5c8   : > { %1291 = vrot.lane.b32.xlu0 %v2066_v6, %s2130_s25 }
 0x63a   : > { %v1292_v7 = vpop.permute.xlu0 %1291 }
 0x63b   : > { %v1294_v8 = vmul.f32 %v1292_v7, %v1275_v1  ;;  %v1144_v1 = vpop.f32.mrf.mxu1 }
 0x63c   : > { %v1145_v2 = vadd.f32 %v2378_v15, %v1144_v1 }
 0x63d   : > { %1298 = vrot.lane.b32.xlu1 %v1294_v8, %s2131_s26 }
 0x6af   : > { %v1299_v9 = vpop.permute.xlu1 %1298 }
 0x6b0   : > { %2007 = vmatmul.msk.f32.vlgmr.msrb.gmra.mxu2 %vm1090_vm4, %v1299_v9 }
 0x6b1   : > { %1574 = vmatpush.msrb.mxu2 %v2303_v49 }
 0x6b3   : > { %1575 = vmatpush.msrb.mxu2 %v2310_v50 }
 0x6b5   : > { %1576 = vmatpush.msrb.mxu2 %v2317_v51 }
 0x6b7   : > { %1577 = vmatpush.msrb.mxu2 %v2324_v53 }
 0x733   : > { %v1319_v12 = vpop.f32.mrf.mxu2 }
 0x734   : > { %v1322_v13 = vadd.f32 %v1319_v12, %v1139_v11 }
 0x736   : > { %2067 = vtanh.f32 %v1322_v13  ;;  %v2008_v16 = vmul.f32 -1.442695, %v1322_v13 }
 0x738   : > { %2069 = vpow2.f32 %v2008_v16 }
 0x73c   : > { %v2068_v14 = vpop.eup %2067 }
 0x73d   : > { %1345 = vrot.lane.b32.xlu2 %v2068_v14, %s2130_s25 }
 0x73e   : > { %v2070_v17 = vpop.eup %2069 }
 0x73f   : > { %v1326_v18 = vadd.f32 1.0, %v2070_v17 }
 0x741   : > { %2071 = vrcp.f32 %v1326_v18  ;;  %v1338_v53 = vand.u32 2147483648, %v1326_v18  ;;  %vm1332_vm14 = vweird.f32 %v1326_v18  ;;  %v1336_v21 = vand.u32 2147483647, %v1326_v18 }
 0x743   : > { %v1339_v23 = vor.u32 1.1754944e-38, %v1338_v53  ;;  %vm1337_vm2 = vcmp.eq.f32.partialorder %v1336_v21, 8.507059e+37 }
 0x747   : > { %v2072_v49 = vpop.eup %2071 }
 0x748   : > { %v1328_v50 = vmul.f32 %v2072_v49, %v1326_v18  ;;  %vm1333_vm13 = vweird.f32 %v2072_v49 }
 0x749   : > { %vm1334_vm15 = vmor %vm1332_vm14, %vm1333_vm13 }
 0x74a   : > { %v1329_v19 = vsub.f32 1.0, %v1328_v50 }
 0x74c   : > { %v1330_v51 = vmul.f32 %v2072_v49, %v1329_v19 }
 0x74e   : > { %v1331_v20 = vadd.f32 %v2072_v49, %v1330_v51 }
 0x750   : > { %v1335_v22 = vsel %vm1334_vm15, %v2072_v49, %v1331_v20 }
 0x751   : > { %v1340_v25 = vsel %vm1337_vm2, %v1339_v23, %v1335_v22 }
 0x752   : > { %v1343_v27 = vmul.f32 %v1340_v25, %v1288_v5 }
 0x797   : > { %v1346_v24 = vpop.permute.xlu2 %1345 }
 0x798   : > { %v1348_v26 = vmul.f32 %v1346_v24, %v1340_v25 }
 0x79a   : > { %1350 = vrot.lane.b32.xlu0 %v1348_v26, %s2130_s25 }
 0x80c   : > { %v1351_v28 = vpop.permute.xlu0 %1350 }
 0x80d   : > { %v1353_v29 = vadd.f32 %v1351_v28, %v1343_v27 }
 0x80f   : > { %2073 = vtanh.f32 %v1353_v29 }
 0x815   : > { %v2074_v30 = vpop.eup %2073 }
 0x816   : > { %1356 = vrot.lane.b32.xlu1 %v2074_v30, %s2130_s25 }
 0x888   : > { %v1357_v31 = vpop.permute.xlu1 %1356 }
 0x889   : > { %v1359_v32 = vmul.f32 %v1357_v31, %v1340_v25  ;;  %v1147_v25 = vpop.f32.mrf.mxu1 }
 0x88a   : > { %v1148_v26 = vadd.f32 %v2378_v15, %v1147_v25 }
 0x88b   : > { %1363 = vrot.lane.b32.xlu2 %v1359_v32, %s2131_s26 }
 0x8e5   : > { %v1364_v33 = vpop.permute.xlu2 %1363 }
 0x8e6   : > { %2009 = vmatmul.msk.f32.vlgmr.msra.gmra.mxu0 %vm1090_vm4, %v1364_v33 }
 0x963   : > { %v1384_v36 = vpop.f32.mrf.mxu0 }
 0x964   : > { %v1387_v37 = vadd.f32 %v1384_v36, %v1142_v35 }
 0x966   : > { %2075 = vtanh.f32 %v1387_v37  ;;  %v2010_v39 = vmul.f32 -1.442695, %v1387_v37 }
 0x968   : > { %2077 = vpow2.f32 %v2010_v39 }
 0x96c   : > { %v2076_v38 = vpop.eup %2075 }
 0x96d   : > { %1410 = vrot.lane.b32.xlu0 %v2076_v38, %s2130_s25 }
 0x96e   : > { %v2078_v40 = vpop.eup %2077 }
 0x96f   : > { %v1391_v41 = vadd.f32 1.0, %v2078_v40 }
 0x971   : > { %2079 = vrcp.f32 %v1391_v41  ;;  %v1403_v47 = vand.u32 2147483648, %v1391_v41  ;;  %vm1397_vm5 = vweird.f32 %v1391_v41  ;;  %v1401_v48 = vand.u32 2147483647, %v1391_v41 }
 0x973   : > { %v1404_v54 = vor.u32 1.1754944e-38, %v1403_v47  ;;  %vm1402_vm7 = vcmp.eq.f32.partialorder %v1401_v48, 8.507059e+37 }
 0x977   : > { %v2080_v42 = vpop.eup %2079 }
 0x978   : > { %v1393_v43 = vmul.f32 %v2080_v42, %v1391_v41  ;;  %vm1398_vm3 = vweird.f32 %v2080_v42 }
 0x979   : > { %vm1399_vm6 = vmor %vm1397_vm5, %vm1398_vm3 }
 0x97a   : > { %v1394_v44 = vsub.f32 1.0, %v1393_v43 }
 0x97c   : > { %v1395_v45 = vmul.f32 %v2080_v42, %v1394_v44 }
 0x97e   : > { %v1396_v46 = vadd.f32 %v2080_v42, %v1395_v45 }
 0x980   : > { %v1400_v52 = vsel %vm1399_vm6, %v2080_v42, %v1396_v46 }
 0x981   : > { %v1405_v56 = vsel %vm1402_vm7, %v1404_v54, %v1400_v52 }
 0x982   : > { %v1408_v58 = vmul.f32 %v1405_v56, %v1353_v29 }
 0x9df   : > { %v1411_v55 = vpop.permute.xlu0 %1410 }
 0x9e0   : > { %v1413_v57 = vmul.f32 %v1411_v55, %v1405_v56 }
 0x9e2   : > { %1415 = vrot.lane.b32.xlu1 %v1413_v57, %s2130_s25 }
 0xa54   : > { %v1416_v59 = vpop.permute.xlu1 %1415 }
 0xa55   : > { %v1418_v60 = vadd.f32 %v1416_v59, %v1408_v58 }
 0xa57   : > { %2081 = vtanh.f32 %v1418_v60 }
 0xa5d   : > { %v2082_v61 = vpop.eup %2081 }
 0xa5e   : > { %1421 = vrot.lane.b32.xlu2 %v2082_v61, %s2130_s25 }
 0xab8   : > { %v1422_v62 = vpop.permute.xlu2 %1421 }
 0xab9   : > { %v1424_v63 = vmul.f32 %v1422_v62, %v1405_v56  ;;  %v1150_v56 = vpop.f32.mrf.mxu1 }
 0xaba   : > { %v1151_v57 = vadd.f32 %v2378_v15, %v1150_v56 }
 0xabb   : > { %1428 = vrot.lane.b32.xlu0 %v1424_v63, %s2131_s26 }
 0xb2d   : > { %v1429_v0 = vpop.permute.xlu0 %1428 }
 0xb2e   : > { %2011 = vmatmul.msk.f32.vlgmr.msra.gmra.mxu2 %vm1090_vm4, %v1429_v0 }
 0xbb1   : > { %v1449_v3 = vpop.f32.mrf.mxu2 }
 0xbb2   : > { %v1452_v4 = vadd.f32 %v1449_v3, %v1145_v2 }
 0xbb4   : > { %2083 = vtanh.f32 %v1452_v4  ;;  %v2012_v6 = vmul.f32 -1.442695, %v1452_v4 }
 0xbb6   : > { %2085 = vpow2.f32 %v2012_v6 }
 0xbba   : > { %v2084_v5 = vpop.eup %2083 }
 0xbbb   : > { %1475 = vrot.lane.b32.xlu1 %v2084_v5, %s2130_s25 }
 0xbbc   : > { %v2086_v7 = vpop.eup %2085 }
 0xbbd   : > { %v1456_v8 = vadd.f32 1.0, %v2086_v7 }
 0xbbf   : > { %2087 = vrcp.f32 %v1456_v8  ;;  %v1468_v14 = vand.u32 2147483648, %v1456_v8  ;;  %vm1462_vm9 = vweird.f32 %v1456_v8  ;;  %v1466_v16 = vand.u32 2147483647, %v1456_v8 }
 0xbc1   : > { %v1469_v18 = vor.u32 1.1754944e-38, %v1468_v14  ;;  %vm1467_vm11 = vcmp.eq.f32.partialorder %v1466_v16, 8.507059e+37 }
 0xbc5   : > { %v2088_v9 = vpop.eup %2087 }
 0xbc6   : > { %v1458_v10 = vmul.f32 %v2088_v9, %v1456_v8  ;;  %vm1463_vm8 = vweird.f32 %v2088_v9 }
 0xbc7   : > { %vm1464_vm10 = vmor %vm1462_vm9, %vm1463_vm8 }
 0xbc8   : > { %v1459_v11 = vsub.f32 1.0, %v1458_v10 }
 0xbca   : > { %v1460_v12 = vmul.f32 %v2088_v9, %v1459_v11 }
 0xbcc   : > { %v1461_v13 = vadd.f32 %v2088_v9, %v1460_v12 }
 0xbce   : > { %v1465_v17 = vsel %vm1464_vm10, %v2088_v9, %v1461_v13 }
 0xbcf   : > { %v1470_v50 = vsel %vm1467_vm11, %v1469_v18, %v1465_v17 }
 0xbd0   : > { %v1473_v51 = vmul.f32 %v1470_v50, %v1418_v60 }
 0xc2d   : > { %v1476_v49 = vpop.permute.xlu1 %1475 }
 0xc2e   : > { %v1478_v19 = vmul.f32 %v1476_v49, %v1470_v50 }
 0xc30   : > { %1480 = vrot.lane.b32.xlu2 %v1478_v19, %s2130_s25 }
 0xc8a   : > { %v1481_v20 = vpop.permute.xlu2 %1480 }
 0xc8b   : > { %v1483_v53 = vadd.f32 %v1481_v20, %v1473_v51 }
 0xc8d   : > { %2089 = vtanh.f32 %v1483_v53 }
 0xc93   : > { %v2090_v21 = vpop.eup %2089 }
 0xc94   : > { %1486 = vrot.lane.b32.xlu0 %v2090_v21, %s2130_s25 }
 0xd06   : > { %v1487_v22 = vpop.permute.xlu0 %1486 }
 0xd07   : > { %v1489_v23 = vmul.f32 %v1487_v22, %v1470_v50  ;;  %v1153_v50 = vpop.f32.mrf.mxu1 }
 0xd08   : > { %v1154_v19 = vadd.f32 %v2378_v15, %v1153_v50 }
 0xd09   : > { %1493 = vrot.lane.b32.xlu1 %v1489_v23, %s2131_s26 }
 0xd7b   : > { %v1494_v24 = vpop.permute.xlu1 %1493 }
 0xd7c   : > { %2013 = vmatmul.msk.f32.vlgmr.msrb.gmra.mxu0 %vm1090_vm4, %v1494_v24 }
 0xdf9   : > { %v1514_v27 = vpop.f32.mrf.mxu0 }
 0xdfa   : > { %v1517_v28 = vadd.f32 %v1514_v27, %v1148_v26 }
 0xdfc   : > { %2091 = vtanh.f32 %v1517_v28  ;;  %v2014_v30 = vmul.f32 -1.442695, %v1517_v28 }
 0xdfe   : > { %2093 = vpow2.f32 %v2014_v30 }
 0xe02   : > { %v2092_v29 = vpop.eup %2091 }
 0xe03   : > { %1540 = vrot.lane.b32.xlu2 %v2092_v29, %s2130_s25 }
 0xe04   : > { %v2094_v31 = vpop.eup %2093 }
 0xe05   : > { %v1521_v32 = vadd.f32 1.0, %v2094_v31 }
 0xe07   : > { %2095 = vrcp.f32 %v1521_v32  ;;  %v1533_v38 = vand.u32 2147483648, %v1521_v32  ;;  %vm1527_vm13 = vweird.f32 %v1521_v32  ;;  %v1531_v39 = vand.u32 2147483647, %v1521_v32 }
 0xe09   : > { %v1534_v41 = vor.u32 1.1754944e-38, %v1533_v38  ;;  %vm1532_vm15 = vcmp.eq.f32.partialorder %v1531_v39, 8.507059e+37 }
 0xe0d   : > { %v2096_v33 = vpop.eup %2095 }
 0xe0e   : > { %v1523_v34 = vmul.f32 %v2096_v33, %v1521_v32  ;;  %vm1528_vm12 = vweird.f32 %v2096_v33 }
 0xe0f   : > { %vm1529_vm14 = vmor %vm1527_vm13, %vm1528_vm12 }
 0xe10   : > { %v1524_v35 = vsub.f32 1.0, %v1523_v34 }
 0xe12   : > { %v1525_v36 = vmul.f32 %v2096_v33, %v1524_v35  ;;  %v1724_v35 = vld [vmem:[%s2517_s12] sm:$0x3] }
 0xe14   : > { %v1526_v37 = vadd.f32 %v2096_v33, %v1525_v36  ;;  %v1727_v36 = vperm.slane %v1724_v35, 0 }
 0xe16   : > { %v1530_v40 = vsel %vm1529_vm14, %v2096_v33, %v1526_v37  ;;  %v1737_v37 = vld [vmem:[%s2518_s13] sm:$0x3] }
 0xe17   : > { %v1535_v43 = vsel %vm1532_vm15, %v1534_v41, %v1530_v40  ;;  %v1739_v38 = vrot.slane %v1737_v37, 1  ;;  %v1726_v40 = vrot.slane %v1724_v35, 1  ;;  %v1687_v41 = vld [vmem:[%s2515_s10] sm:$0xf]  ;;  %v2025_v35 = vld [vmem:[%s2521_s16 + $0x30] sm:$0xff] }
 0xe18   : > { %v1538_v45 = vmul.f32 %v1535_v43, %v1483_v53  ;;  %2019 = vmatpush.msk.msra.mxu0 %vm629_vm0, %v1687_v41 }
 0xe19   : > { %v1741_v39 = vperm.slane %v1739_v38, 0  ;;  %v2023_v38 = vld [vmem:[%s2521_s16 + $0x20] sm:$0xff] }
 0xe5d   : > { %v1541_v42 = vpop.permute.xlu2 %1540 }
 0xe5e   : > { %v1543_v44 = vmul.f32 %v1541_v42, %v1535_v43  ;;  %v1685_v42 = vld [vmem:[%s589_s22] sm:$0xff] }
 0xe5f   : > { %2020 = vmatmul.msk.f32.vlgmr.msra.gmra.mxu0 %vm604_vm1, %v1685_v42 }
 0xe60   : > { %1545 = vrot.lane.b32.xlu0 %v1543_v44, %s2130_s25  ;;  %v1686_v44 = vld [vmem:[%s589_s22 + $0x8] sm:$0xff] }
 0xe67   : > { %2021 = vmatmul.msk.f32.gmra.mxu0 %vm604_vm1, %v1686_v44  ;;  %v2048_v44 = vld [vmem:[%s2519_s14] ss:$0 sm:$0xff] }
 0xed2   : > { %v1546_v46 = vpop.permute.xlu0 %1545 }
 0xed3   : > { %v1548_v47 = vadd.f32 %v1546_v46, %v1538_v45 }
 0xed5   : > { %2097 = vtanh.f32 %v1548_v47 }
 0xedb   : > { %v2098_v48 = vpop.eup %2097 }
 0xedc   : > { %1551 = vrot.lane.b32.xlu1 %v2098_v48, %s2130_s25 }
 0xf4e   : > { %v1552_v52 = vpop.permute.xlu1 %1551 }
 0xf4f   : > { %v1554_v54 = vmul.f32 %v1552_v52, %v1535_v43  ;;  %v1728_v43 = vperm.slane %v1726_v40, 0  ;;  %v1740_v52 = vperm.slane %v1737_v37, 0  ;;  %v2024_v37 = vld [vmem:[%s2521_s16 + $0x28] sm:$0xff] }
 0xf51   : > { %1558 = vrot.lane.b32.xlu2 %v1554_v54, %s2131_s26 }
 0xfab   : > { %v1559_v55 = vpop.permute.xlu2 %1558 }
 0xfac   : > { %2015 = vmatmul.msk.f32.vlgmr.msrb.gmra.mxu2 %vm1090_vm4, %v1559_v55 }
0x102f   : > { %v1579_v58 = vpop.f32.mrf.mxu2 }
0x1030   : > { %v1582_v59 = vadd.f32 %v1579_v58, %v1151_v57 }
0x1032   : > { %2099 = vtanh.f32 %v1582_v59  ;;  %v2016_v61 = vmul.f32 -1.442695, %v1582_v59 }
0x1034   : > { %2101 = vpow2.f32 %v2016_v61 }
0x1038   : > { %v2100_v60 = vpop.eup %2099 }
0x1039   : > { %1605 = vrot.lane.b32.xlu0 %v2100_v60, %s2130_s25 }
0x103a   : > { %v2102_v62 = vpop.eup %2101 }
0x103b   : > { %v1586_v63 = vadd.f32 1.0, %v2102_v62 }
0x103d   : > { %2103 = vrcp.f32 %v1586_v63  ;;  %v1598_v5 = vand.u32 2147483648, %v1586_v63  ;;  %vm1592_vm3 = vweird.f32 %v1586_v63  ;;  %v1596_v6 = vand.u32 2147483647, %v1586_v63 }
0x103f   : > { %v1599_v8 = vor.u32 1.1754944e-38, %v1598_v5  ;;  %vm1597_vm6 = vcmp.eq.f32.partialorder %v1596_v6, 8.507059e+37 }
0x1043   : > { %v2104_v0 = vpop.eup %2103 }
0x1044   : > { %v1588_v1 = vmul.f32 %v2104_v0, %v1586_v63  ;;  %vm1593_vm2 = vweird.f32 %v2104_v0 }
0x1045   : > { %vm1594_vm5 = vmor %vm1592_vm3, %vm1593_vm2  ;;  %vm1886_vm2 = vcmask 15360  }
0x1046   : > { %v1589_v2 = vsub.f32 1.0, %v1588_v1  ;;  %v1718_v1 = vpop.f32.mrf.mxu0 }
0x1048   : > { %v1590_v3 = vmul.f32 %v2104_v0, %v1589_v2 }
0x104a   : > { %v1591_v4 = vadd.f32 %v2104_v0, %v1590_v3 }
0x104c   : > { %v1595_v7 = vsel %vm1594_vm5, %v2104_v0, %v1591_v4  ;;  %v2047_v0 = vld [vmem:[%s2516_s11] ss:$0 sm:$0xff] }
0x104d   : > { %v1600_v10 = vsel %vm1597_vm6, %v1599_v8, %v1595_v7  ;;  %v1719_v2 = vadd.f32 %v2047_v0, %v1718_v1 }
0x104e   : > { %v1603_v12 = vmul.f32 %v1600_v10, %v1548_v47  ;;  %v1721_v7 = vpop.f32.mrf.mxu0 }
0x104f   : > { %v1722_v8 = vadd.f32 %v2047_v0, %v1721_v7 }
0x10ab   : > { %v1606_v9 = vpop.permute.xlu0 %1605 }
0x10ac   : > { %v1608_v11 = vmul.f32 %v1606_v9, %v1600_v10 }
0x10ae   : > { %1610 = vrot.lane.b32.xlu1 %v1608_v11, %s2130_s25 }
0x1120   : > { %v1611_v13 = vpop.permute.xlu1 %1610 }
0x1121   : > { %v1613_v14 = vadd.f32 %v1611_v13, %v1603_v12  ;;  %v2132_v13 = vmov 32.0  }
0x1123   : > { %2105 = vtanh.f32 %v1613_v14 }
0x1129   : > { %v2106_v16 = vpop.eup %2105 }
0x112a   : > { %1616 = vrot.lane.b32.xlu2 %v2106_v16, %s2130_s25 }
0x1184   : > { %v1617_v17 = vpop.permute.xlu2 %1616 }
0x1185   : > { %v1619_v18 = vmul.f32 %v1617_v17, %v1600_v10 }
0x1187   : > { %1623 = vrot.lane.b32.xlu0 %v1619_v18, %s2131_s26 }
0x11f9   : > { %v1624_v49 = vpop.permute.xlu0 %1623 }
0x11fa   : > { %2017 = vmatmul.msk.f32.vlgmr.msra.gmra.mxu3 %vm1090_vm4, %v1624_v49 }
0x127d   : > { %v1644_v51 = vpop.f32.mrf.mxu3 }
0x127e   : > { %v1647_v20 = vadd.f32 %v1644_v51, %v1154_v19 }
0x1280   : > { %2107 = vtanh.f32 %v1647_v20  ;;  %v2018_v21 = vmul.f32 -1.442695, %v1647_v20 }
0x1282   : > { %2109 = vpow2.f32 %v2018_v21 }
0x1286   : > { %v2108_v53 = vpop.eup %2107 }
0x1287   : > { %1670 = vrot.lane.b32.xlu1 %v2108_v53, %s2130_s25 }
0x1288   : > { %v2110_v22 = vpop.eup %2109 }
0x1289   : > { %v1651_v23 = vadd.f32 1.0, %v2110_v22 }
0x128b   : > { %2111 = vrcp.f32 %v1651_v23  ;;  %v1663_v29 = vand.u32 2147483648, %v1651_v23  ;;  %vm1657_vm8 = vweird.f32 %v1651_v23  ;;  %v1661_v15 = vand.u32 2147483647, %v1651_v23 }
0x128d   : > { %v1664_v31 = vor.u32 1.1754944e-38, %v1663_v29  ;;  %vm1662_vm10 = vcmp.eq.f32.partialorder %v1661_v15, 8.507059e+37  ;;  %v1827_v29 = vld [vmem:[%s2521_s16 + $0x8] sm:$0xff]  ;;  %v1826_v15 = vld [vmem:[%s2521_s16] sm:$0xff] }
0x128f   : > { %1729 = vrot.lane.b32.xlu1 %v1727_v36, %s2131_s26 }
0x1291   : > { %v2112_v24 = vpop.eup %2111 }
0x1292   : > { %v1653_v25 = vmul.f32 %v2112_v24, %v1651_v23  ;;  %vm1658_vm7 = vweird.f32 %v2112_v24 }
0x1293   : > { %vm1659_vm9 = vmor %vm1657_vm8, %vm1658_vm7 }
0x1294   : > { %v1654_v26 = vsub.f32 1.0, %v1653_v25 }
0x1296   : > { %v1655_v27 = vmul.f32 %v2112_v24, %v1654_v26 }
0x1297   : > { %1744 = vrot.lane.b32.xlu1 %v1741_v39, %s2131_s26 }
0x1298   : > { %v1656_v28 = vadd.f32 %v2112_v24, %v1655_v27  ;;  %v1829_v27 = vld [vmem:[%s2521_s16 + $0x18] sm:$0xff] }
0x1299   : > { %1845 = vmatpush.msra.mxu2 %v1829_v27 }
0x129a   : > { %v1660_v30 = vsel %vm1659_vm9, %v2112_v24, %v1656_v28  ;;  %v1828_v28 = vld [vmem:[%s2521_s16 + $0x10] sm:$0xff] }
0x129b   : > { %v1665_v33 = vsel %vm1662_vm10, %v1664_v31, %v1660_v30  ;;  %1846 = vmatpush.msra.mxu2 %v1828_v28 }
0x129c   : > { %v1668_v45 = vmul.f32 %v1665_v33, %v1613_v14 }
0x129d   : > { %1847 = vmatpush.msra.mxu2 %v1827_v29 }
0x129f   : > { %1848 = vmatpush.msra.mxu2 %v1826_v15 }
0x12f9   : > { %v1671_v32 = vpop.permute.xlu1 %1670 }
0x12fa   : > { %v1673_v34 = vmul.f32 %v1671_v32, %v1665_v33 }
0x12fc   : > { %1675 = vrot.lane.b32.xlu2 %v1673_v34, %s2130_s25 }
0x1301   : > { %v1730_v54 = vpop.permute.xlu1 %1729 }
0x1304   : > { %1731 = vrot.lane.b32.xlu2 %v1728_v43, %s2131_s26 }
0x1309   : > { %v1745_v58 = vpop.permute.xlu1 %1744 }
0x1356   : > { %v1676_v46 = vpop.permute.xlu2 %1675 }
0x1357   : > { %v1678_v47 = vadd.f32 %v1676_v46, %v1668_v45 }
0x1359   : > { %2113 = vtanh.f32 %v1678_v47 }
0x135a   : > { %2115 = vrcp.f32 %v2132_v13 }
0x135e   : > { %v1732_v56 = vpop.permute.xlu2 %1731 }
0x135f   : > { %v2114_v48 = vpop.eup %2113 }
0x1360   : > { %1681 = vrot.lane.b32.xlu0 %v2114_v48, %s2130_s25  ;;  %v2116_v14 = vpop.eup %2115 }
0x1361   : > { %v1769_v16 = vmul.f32 32.0, %v2116_v14  ;;  %vm1773_vm0 = vweird.f32 %v2116_v14 }
0x1363   : > { %v1770_v17 = vsub.f32 1.0, %v1769_v16 }
0x1365   : > { %v1771_v18 = vmul.f32 %v2116_v14, %v1770_v17 }
0x1367   : > { %v1772_v49 = vadd.f32 %v2116_v14, %v1771_v18 }
0x1368   : > { %1742 = vrot.lane.b32.xlu0 %v1740_v52, %s2131_s26  ;;  %v2049_v52 = vld [vmem:[%s2520_s15] ss:$0 sm:$0xff] }
0x1369   : > { %v1774_v50 = vsel %vm1773_vm0, %v2116_v14, %v1772_v49 }
0x13d2   : > { %v1682_v55 = vpop.permute.xlu0 %1681 }
0x13d3   : > { %v1684_v57 = vmul.f32 %v1682_v55, %v1665_v33  ;;  %v2026_v33 = vld [vmem:[%s2521_s16 + $0x38] sm:$0xff] }
0x13d4   : > { %1877 = vmatpush.msrb.mxu3 %v2026_v33 }
0x13d5   : > { %v1736_v59 = vmul.f32 %v1732_v56, %v1684_v57  ;;  %v1735_v61 = vmul.f32 %v1730_v54, %v1684_v57 }
0x13d6   : > { %1878 = vmatpush.msrb.mxu3 %v2025_v35 }
0x13d7   : > { %v1749_v60 = vadd.f32 %v1745_v58, %v1736_v59 }
0x13d8   : > { %1879 = vmatpush.msrb.mxu3 %v2024_v37 }
0x13d9   : > { %1754 = vrot.lane.b32.xlu0 %v1749_v60, %s2131_s26 }
0x13da   : > { %v1743_v62 = vpop.permute.xlu0 %1742  ;;  %1880 = vmatpush.msrb.mxu3 %v2023_v38 }
0x13db   : > { %v1748_v63 = vadd.f32 %v1743_v62, %v1735_v61 }
0x13dd   : > { %1752 = vrot.lane.b32.xlu2 %v1748_v63, %s2131_s26 }
0x1437   : > { %v1753_v3 = vpop.permute.xlu2 %1752 }
0x1438   : > { %v1758_v4 = vadd.f32 %v1753_v3, %v1719_v2  ;;  %v2050_v2 = vld [vmem:[%s2522_s17] ss:$0 sm:$0xff] }
0x143a   : > { %v1760_v5 = vmax.f32 %v1758_v4, 0.0 }
0x143c   : > { %v1762_v6 = vsel %vm1090_vm4, %v1760_v5, 0.0 }
0x143d   : > { %1763 = vadd.xlane.f32.xlu1 %v1762_v6 }
0x144b   : > { %v1755_v9 = vpop.permute.xlu0 %1754 }
0x144c   : > { %v1759_v10 = vadd.f32 %v1755_v9, %v1722_v8 }
0x144e   : > { %v1761_v11 = vmax.f32 %v1759_v10, 0.0 }
0x1450   : > { %v1765_v12 = vsel %vm1090_vm4, %v1761_v11, 0.0 }
0x1451   : > { %1766 = vadd.xlane.f32.xlu2 %v1765_v12 }
0x14b0   : > { %v1764_v19 = vpop.xlane.xlu1 %1763 }
0x14b1   : > { %v1775_v51 = vmul.f32 %v1774_v50, %v1764_v19 }
0x14b3   : > { %v1777_v20 = vsub.f32 %v1760_v5, %v1775_v51 }
0x14b5   : > { %v1779_v53 = vmul.f32 %v1777_v20, %v1777_v20 }
0x14b7   : > { %v1781_v21 = vsel %vm1090_vm4, %v1779_v53, 0.0 }
0x14b8   : > { %1782 = vadd.xlane.f32.xlu0 %v1781_v21 }
0x14c4   : > { %v1767_v22 = vpop.xlane.xlu2 %1766 }
0x14c5   : > { %v1776_v23 = vmul.f32 %v1774_v50, %v1767_v22 }
0x14c7   : > { %v1778_v24 = vsub.f32 %v1761_v11, %v1776_v23 }
0x14c9   : > { %v1780_v25 = vmul.f32 %v1778_v24, %v1778_v24 }
0x14cb   : > { %v1784_v26 = vsel %vm1090_vm4, %v1780_v25, 0.0 }
0x14cc   : > { %1785 = vadd.xlane.f32.xlu2 %v1784_v26 }
0x152b   : > { %v1783_v30 = vpop.xlane.xlu0 %1782 }
0x152c   : > { %v1787_v31 = vmul.f32 %v1783_v30, %v1774_v50 }
0x152e   : > { %v1789_v32 = vadd.f32 1e-05, %v1787_v31 }
0x1530   : > { %2117 = vrsqrt.f32 %v1789_v32  ;;  %vm1797_vm11 = vweird.f32 %v1789_v32 }
0x1536   : > { %v2118_v34 = vpop.eup %2117 }
0x1537   : > { %v1792_v36 = vmul.f32 %v2118_v34, %v1789_v32  ;;  %vm1798_vm1 = vweird.f32 %v2118_v34 }
0x1538   : > { %vm1799_vm12 = vmor %vm1797_vm11, %vm1798_vm1 }
0x1539   : > { %v1793_v39 = vmul.f32 %v2118_v34, %v1792_v36 }
0x153b   : > { %v1794_v40 = vmul.f32 0.5, %v1793_v39 }
0x153d   : > { %v1795_v41 = vsub.f32 1.5, %v1794_v40 }
0x153f   : > { %v1796_v42 = vmul.f32 %v2118_v34, %v1795_v41  ;;  %v1786_v43 = vpop.xlane.xlu2 %1785 }
0x1540   : > { %v1788_v45 = vmul.f32 %v1786_v43, %v1774_v50 }
0x1541   : > { %v1800_v46 = vsel %vm1799_vm12, %v2118_v34, %v1796_v42 }
0x1542   : > { %v1811_v47 = vmul.f32 %v1800_v46, %v1777_v20  ;;  %v1790_v48 = vadd.f32 1e-05, %v1788_v45 }
0x1544   : > { %v1817_v54 = vmul.f32 %v2048_v44, %v1811_v47  ;;  %2119 = vrsqrt.f32 %v1790_v48  ;;  %vm1807_vm14 = vweird.f32 %v1790_v48 }
0x1546   : > { %v1823_v55 = vadd.f32 %v2049_v52, %v1817_v54 }
0x1548   : > { %2022 = vmatmul.msk.f32.vlgmr.msra.gmra.mxu2 %vm1090_vm4, %v1823_v55 }
0x154a   : > { %v2120_v56 = vpop.eup %2119 }
0x154b   : > { %v1802_v57 = vmul.f32 %v2120_v56, %v1790_v48  ;;  %vm1808_vm13 = vweird.f32 %v2120_v56 }
0x154c   : > { %vm1809_vm15 = vmor %vm1807_vm14, %vm1808_vm13 }
0x154d   : > { %v1803_v58 = vmul.f32 %v2120_v56, %v1802_v57 }
0x154f   : > { %v1804_v59 = vmul.f32 0.5, %v1803_v58 }
0x1551   : > { %v1805_v60 = vsub.f32 1.5, %v1804_v59 }
0x1553   : > { %v1806_v61 = vmul.f32 %v2120_v56, %v1805_v60 }
0x1555   : > { %v1810_v62 = vsel %vm1809_vm15, %v2120_v56, %v1806_v61 }
0x1556   : > { %v1812_v63 = vmul.f32 %v1810_v62, %v1778_v24 }
0x1558   : > { %v1818_v0 = vmul.f32 %v2048_v44, %v1812_v63 }
0x155a   : > { %v1824_v1 = vadd.f32 %v2049_v52, %v1818_v0 }
0x155c   : > { %2027 = vmatmul.msk.f32.vlgmr.msrb.gmra.mxu3 %vm1090_vm4, %v1824_v1 }
0x15cb   : > { %v1850_v3 = vpop.f32.mrf.mxu2 }
0x15cc   : > { %v1856_v4 = vadd.f32 %v2050_v2, %v1850_v3 }
0x15df   : > { %v1882_v5 = vpop.f32.mrf.mxu3 }
0x15e0   : > { %v1885_v6 = vadd.f32 %v1882_v5, %v1856_v4 }
0x15e2   : > { %1887 = vst.msk [vmem:[%s593_s29] sm:$0xff] %vm1886_vm2, %v1885_v6 }
0x15e3 PF: > { %s28_s27 = sadd.s32 1, %s2127_s27  }
0x15e4   : > { %p25_p4 = scmp.ge.s32.totalorder %s28_s27, 4  }
0x15e6   :  { %27 = sbr.rel (!%p25_p4) target bundleno = 4 (0x4), region = 133 }

</bundles_post_ra>
